<compile_context>
chip_gen: v7x
topology: tpu7x:2x2x1
jax: 0.10.0
libtpu: 0.0.40
codegen_flags: <defaults>
</compile_context>

<pallas_src>
import functools

import jax
import jax.numpy as jnp
from jax.experimental import pallas as pl
from jax.experimental.pallas import tpu as pltpu

EPS = 1e-5
KH = KW = 3  # KERNEL_SIZE_G


def _resblock_kernel(x_ref, w1_ref, w2_ref, mask_ref, o_ref, ybuf_ref,
                     *, H, W, C):
    # x_ref : (C, Lm)  reflect-padded x, spatially flattened, zero margins M
    # w*_ref: (9, C, C) per-tap (Cout, Cin) weights, tap index t = ky*3 + kx
    # mask  : (1, L)   1.0 at interior positions of the padded grid
    # o_ref : (C, L)   output over the padded grid (interior positions valid)
    # ybuf  : (C, Lm)  VMEM scratch: reflect-padded stage-1 activation
    Hp, Wp = H + 2, W + 2
    L = Hp * Wp
    M = Wp + 1                      # margin so every tap slice stays in-bounds
    inv_n = 1.0 / float(H * W)

    interior = mask_ref[...] > 0.5  # (1, L) bool

    def conv3x3(src_ref, w_ref):
        # 3x3 conv as 9 shifted contiguous-slice matmuls on the flat slab.
        acc = None
        for t in range(KH * KW):
            ky, kx = divmod(t, KW)
            s = ky * Wp + kx        # = M + (ky-1)*Wp + (kx-1)
            part = jnp.dot(w_ref[t], src_ref[:, s:s + L],
                           preferred_element_type=jnp.float32)
            acc = part if acc is None else acc + part
        return acc                  # (C, L) f32

    def instance_norm(acc):
        # Two-pass per-channel stats over the valid interior only (lane reduce).
        asum = jnp.sum(jnp.where(interior, acc, 0.0), axis=1, keepdims=True)
        mean = asum * inv_n
        cent = acc - mean
        vsum = jnp.sum(jnp.where(interior, cent * cent, 0.0),
                       axis=1, keepdims=True)
        return cent * jax.lax.rsqrt(vsum * inv_n + EPS)

    # ---- stage 1: conv1 -> InstanceNorm -> ReLU (stays in VMEM) ----
    y1 = jnp.maximum(instance_norm(conv3x3(x_ref, w1_ref)), 0.0)   # (C, L)

    # Store y1 in the same flat padded layout and rebuild its reflect ring
    # in place (ring positions of y1 are don't-cares at this point).
    ybuf_ref[:, 0:M] = jnp.zeros((C, M), jnp.float32)
    ybuf_ref[:, M + L:M + L + M] = jnp.zeros((C, M), jnp.float32)
    ybuf_ref[:, M:M + L] = y1
    # reflect rows: padded row 0 <- padded row 2, padded row Hp-1 <- row Hp-3
    ybuf_ref[:, M:M + Wp] = ybuf_ref[:, M + 2 * Wp:M + 3 * Wp]
    ybuf_ref[:, M + (Hp - 1) * Wp:M + Hp * Wp] = (
        ybuf_ref[:, M + (Hp - 3) * Wp:M + (Hp - 2) * Wp])
    # reflect columns: col 0 <- col 2, col Wp-1 <- col Wp-3 (per padded row)
    for r in range(Hp):
        b = M + r * Wp
        ybuf_ref[:, b:b + 1] = ybuf_ref[:, b + 2:b + 3]
        ybuf_ref[:, b + Wp - 1:b + Wp] = ybuf_ref[:, b + Wp - 3:b + Wp - 2]

    # ---- stage 2: conv2 -> InstanceNorm -> + residual (fused) ----
    y2 = instance_norm(conv3x3(ybuf_ref, w2_ref))                  # (C, L)
    o_ref[...] = (y2 + x_ref[:, M:M + L]).astype(o_ref.dtype)


def residual_block_forward(x_nchw, w1, b1, w2, b2):
    """Pallas ResidualBlock forward.  x_nchw: (N, C, H, W); w*: (C, C, 3, 3)."""
    del b1, b2  # cancelled exactly by the affine=False InstanceNorm (see header)
    N, C, H, W = x_nchw.shape
    Hp, Wp = H + 2, W + 2
    L = Hp * Wp
    M = Wp + 1
    Lm = L + 2 * M

    x = x_nchw.astype(jnp.float32)
    # reflect-pad + flatten spatial (cheap, ~1.3x of x); zero margins so every
    # in-kernel tap slice stays in bounds.
    xpad = jnp.pad(x, ((0, 0), (0, 0), (1, 1), (1, 1)), mode="reflect")
    xflat = jnp.pad(xpad.reshape(N, C, L), ((0, 0), (0, 0), (M, M)))

    # per-tap (Cout, Cin) weight matrices, tap-major (t = ky*3 + kx)
    wt1 = jnp.transpose(w1, (2, 3, 0, 1)).reshape(KH * KW, C, C).astype(jnp.float32)
    wt2 = jnp.transpose(w2, (2, 3, 0, 1)).reshape(KH * KW, C, C).astype(jnp.float32)

    # interior mask of the padded grid (built host-side: no int div/mod in-kernel)
    rr = jnp.arange(Hp)
    cc = jnp.arange(Wp)
    interior = (((rr >= 1) & (rr <= H))[:, None]
                & ((cc >= 1) & (cc <= W))[None, :])
    mask = interior.reshape(1, L).astype(jnp.float32)

    kernel = functools.partial(_resblock_kernel, H=H, W=W, C=C)
    out_flat = pl.pallas_call(
        kernel,
        out_shape=jax.ShapeDtypeStruct((N, C, L), jnp.float32),
        grid=(N,),
        in_specs=[
            pl.BlockSpec((None, C, Lm), lambda n: (n, 0, 0)),       # x (flat)
            pl.BlockSpec((KH * KW, C, C), lambda n: (0, 0, 0)),     # w1 taps
            pl.BlockSpec((KH * KW, C, C), lambda n: (0, 0, 0)),     # w2 taps
            pl.BlockSpec((1, L), lambda n: (0, 0)),                 # mask
        ],
        out_specs=pl.BlockSpec((None, C, L), lambda n: (n, 0, 0)),
        scratch_shapes=[pltpu.VMEM((C, Lm), jnp.float32)],
        compiler_params=pltpu.CompilerParams(
            dimension_semantics=("parallel",)),
    )(xflat, wt1, wt2, mask)

    # extract the valid interior -> NCHW (cheap strided slice, no transpose)
    return out_flat.reshape(N, C, Hp, Wp)[:, :, 1:H + 1, 1:W + 1]


# ----------------------------- pure-JAX reference -----------------------------
def _ref_instance_norm(x_nchw):
    m = jnp.mean(x_nchw, axis=(2, 3), keepdims=True)
    v = jnp.var(x_nchw, axis=(2, 3), keepdims=True)
    return (x_nchw - m) * jax.lax.rsqrt(v + EPS)


def _ref_conv(x_nchw, w, b):
    xp = jnp.pad(x_nchw, ((0, 0), (0, 0), (1, 1), (1, 1)), mode="reflect")
    y = jax.lax.conv_general_dilated(
        xp, w, window_strides=(1, 1), padding="VALID",
        dimension_numbers=("NCHW", "OIHW", "NCHW"))
    return y + b.reshape(1, -1, 1, 1)


def _ref_residual_block(x, w1, b1, w2, b2):
    h = jax.nn.relu(_ref_instance_norm(_ref_conv(x, w1, b1)))
    h = _ref_instance_norm(_ref_conv(h, w2, b2))
    return x + h


# ------------------------------------ main ------------------------------------
if __name__ == "__main__":
    N, C, H, W = 2, 4, 16, 16

    key = jax.random.PRNGKey(0)
    kx, kw1, kb1, kw2, kb2 = jax.random.split(key, 5)

    x = jax.random.normal(kx, (N, C, H, W), dtype=jnp.float32)
    w1 = 0.1 * jax.random.normal(kw1, (C, C, KH, KW), dtype=jnp.float32)
    b1 = 0.1 * jax.random.normal(kb1, (C,), dtype=jnp.float32)
    w2 = 0.1 * jax.random.normal(kw2, (C, C, KH, KW), dtype=jnp.float32)
    b2 = 0.1 * jax.random.normal(kb2, (C,), dtype=jnp.float32)

    out = jax.jit(residual_block_forward)(x, w1, b1, w2, b2)
    out = jax.block_until_ready(out)

    ref = jax.block_until_ready(_ref_residual_block(x, w1, b1, w2, b2))
    assert out.shape == (N, C, H, W)
    assert jnp.allclose(out, ref, rtol=1e-3, atol=1e-3), (
        float(jnp.max(jnp.abs(out - ref))))

    print("KERNEL_OK")
</pallas_src>

<mosaic_0001>
module attributes {stable_mosaic.version = 11 : i64} {
  func.func @_resblock_kernel(%arg0: i32, %arg1: memref<1x4x362xf32, #tpu.memory_space<vmem>>, %arg2: memref<9x4x4xf32, #tpu.memory_space<vmem>>, %arg3: memref<9x4x4xf32, #tpu.memory_space<vmem>>, %arg4: memref<1x324xf32, #tpu.memory_space<vmem>>, %arg5: memref<1x4x324xf32, #tpu.memory_space<vmem>>, %arg6: memref<4x362xf32, #tpu.memory_space<vmem>>) attributes {dimension_semantics = [#tpu.dimension_semantics<parallel>], iteration_bounds = array<i64: 2>, scalar_prefetch = 0 : i64, scratch_operands = 1 : i64, tpu.core_type = #tpu.core_type<tc>, window_params = [{transform_indices = @transform_0, window_bounds = array<i64: 1, 4, 362>}, {pipeline_mode = #tpu.pipeline_mode<synchronous>, transform_indices = @transform_1, window_bounds = array<i64: 9, 4, 4>}, {pipeline_mode = #tpu.pipeline_mode<synchronous>, transform_indices = @transform_2, window_bounds = array<i64: 9, 4, 4>}, {pipeline_mode = #tpu.pipeline_mode<synchronous>, transform_indices = @transform_3, window_bounds = array<i64: 1, 324>}, {transform_indices = @transform_4, window_bounds = array<i64: 1, 4, 324>}]} {
    %c0 = arith.constant 0 : index
    %c0_0 = arith.constant 0 : index
    %0 = vector.load %arg4[%c0, %c0_0] : memref<1x324xf32, #tpu.memory_space<vmem>>, vector<1x324xf32>
    %cst = arith.constant 5.000000e-01 : f32
    %1 = vector.broadcast %cst : f32 to vector<1x324xf32>
    %2 = arith.cmpf ogt, %0, %1 : vector<1x324xf32>
    %c0_1 = arith.constant 0 : index
    %c0_2 = arith.constant 0 : index
    %c0_3 = arith.constant 0 : index
    %3 = vector.load %arg2[%c0_1, %c0_2, %c0_3] : memref<9x4x4xf32, #tpu.memory_space<vmem>>, vector<1x4x4xf32>
    %4 = vector.shape_cast %3 : vector<1x4x4xf32> to vector<4x4xf32>
    %c0_4 = arith.constant 0 : index
    %c0_5 = arith.constant 0 : index
    %c0_6 = arith.constant 0 : index
    %5 = vector.load %arg1[%c0_4, %c0_5, %c0_6] : memref<1x4x362xf32, #tpu.memory_space<vmem>>, vector<1x4x324xf32>
    %6 = vector.shape_cast %5 : vector<1x4x324xf32> to vector<4x324xf32>
    %cst_7 = arith.constant dense<0.000000e+00> : vector<4x324xf32>
    %7 = tpu.matmul %4, %6, %cst_7 {dimension_numbers = #tpu.dot_dimension_numbers<[1], [0], [0], [1], [0, 0, 1, 1], [], []>} : vector<4x4xf32>, vector<4x324xf32>, vector<4x324xf32> -> vector<4x324xf32>
    %c1 = arith.constant 1 : index
    %c0_8 = arith.constant 0 : index
    %c0_9 = arith.constant 0 : index
    %8 = vector.load %arg2[%c1, %c0_8, %c0_9] : memref<9x4x4xf32, #tpu.memory_space<vmem>>, vector<1x4x4xf32>
    %9 = vector.shape_cast %8 : vector<1x4x4xf32> to vector<4x4xf32>
    %c0_10 = arith.constant 0 : index
    %c0_11 = arith.constant 0 : index
    %c1_12 = arith.constant 1 : index
    %10 = vector.load %arg1[%c0_10, %c0_11, %c1_12] : memref<1x4x362xf32, #tpu.memory_space<vmem>>, vector<1x4x324xf32>
    %11 = vector.shape_cast %10 : vector<1x4x324xf32> to vector<4x324xf32>
    %cst_13 = arith.constant dense<0.000000e+00> : vector<4x324xf32>
    %12 = tpu.matmul %9, %11, %cst_13 {dimension_numbers = #tpu.dot_dimension_numbers<[1], [0], [0], [1], [0, 0, 1, 1], [], []>} : vector<4x4xf32>, vector<4x324xf32>, vector<4x324xf32> -> vector<4x324xf32>
    %13 = arith.addf %7, %12 : vector<4x324xf32>
    %c2 = arith.constant 2 : index
    %c0_14 = arith.constant 0 : index
    %c0_15 = arith.constant 0 : index
    %14 = vector.load %arg2[%c2, %c0_14, %c0_15] : memref<9x4x4xf32, #tpu.memory_space<vmem>>, vector<1x4x4xf32>
    %15 = vector.shape_cast %14 : vector<1x4x4xf32> to vector<4x4xf32>
    %c0_16 = arith.constant 0 : index
    %c0_17 = arith.constant 0 : index
    %c2_18 = arith.constant 2 : index
    %16 = vector.load %arg1[%c0_16, %c0_17, %c2_18] : memref<1x4x362xf32, #tpu.memory_space<vmem>>, vector<1x4x324xf32>
    %17 = vector.shape_cast %16 : vector<1x4x324xf32> to vector<4x324xf32>
    %cst_19 = arith.constant dense<0.000000e+00> : vector<4x324xf32>
    %18 = tpu.matmul %15, %17, %cst_19 {dimension_numbers = #tpu.dot_dimension_numbers<[1], [0], [0], [1], [0, 0, 1, 1], [], []>} : vector<4x4xf32>, vector<4x324xf32>, vector<4x324xf32> -> vector<4x324xf32>
    %19 = arith.addf %13, %18 : vector<4x324xf32>
    %c3 = arith.constant 3 : index
    %c0_20 = arith.constant 0 : index
    %c0_21 = arith.constant 0 : index
    %20 = vector.load %arg2[%c3, %c0_20, %c0_21] : memref<9x4x4xf32, #tpu.memory_space<vmem>>, vector<1x4x4xf32>
    %21 = vector.shape_cast %20 : vector<1x4x4xf32> to vector<4x4xf32>
    %c0_22 = arith.constant 0 : index
    %c0_23 = arith.constant 0 : index
    %c18 = arith.constant 18 : index
    %22 = vector.load %arg1[%c0_22, %c0_23, %c18] : memref<1x4x362xf32, #tpu.memory_space<vmem>>, vector<1x4x324xf32>
    %23 = vector.shape_cast %22 : vector<1x4x324xf32> to vector<4x324xf32>
    %cst_24 = arith.constant dense<0.000000e+00> : vector<4x324xf32>
    %24 = tpu.matmul %21, %23, %cst_24 {dimension_numbers = #tpu.dot_dimension_numbers<[1], [0], [0], [1], [0, 0, 1, 1], [], []>} : vector<4x4xf32>, vector<4x324xf32>, vector<4x324xf32> -> vector<4x324xf32>
    %25 = arith.addf %19, %24 : vector<4x324xf32>
    %c4 = arith.constant 4 : index
    %c0_25 = arith.constant 0 : index
    %c0_26 = arith.constant 0 : index
    %26 = vector.load %arg2[%c4, %c0_25, %c0_26] : memref<9x4x4xf32, #tpu.memory_space<vmem>>, vector<1x4x4xf32>
    %27 = vector.shape_cast %26 : vector<1x4x4xf32> to vector<4x4xf32>
    %c0_27 = arith.constant 0 : index
    %c0_28 = arith.constant 0 : index
    %c19 = arith.constant 19 : index
    %28 = vector.load %arg1[%c0_27, %c0_28, %c19] : memref<1x4x362xf32, #tpu.memory_space<vmem>>, vector<1x4x324xf32>
    %29 = vector.shape_cast %28 : vector<1x4x324xf32> to vector<4x324xf32>
    %cst_29 = arith.constant dense<0.000000e+00> : vector<4x324xf32>
    %30 = tpu.matmul %27, %29, %cst_29 {dimension_numbers = #tpu.dot_dimension_numbers<[1], [0], [0], [1], [0, 0, 1, 1], [], []>} : vector<4x4xf32>, vector<4x324xf32>, vector<4x324xf32> -> vector<4x324xf32>
    %31 = arith.addf %25, %30 : vector<4x324xf32>
    %c5 = arith.constant 5 : index
    %c0_30 = arith.constant 0 : index
    %c0_31 = arith.constant 0 : index
    %32 = vector.load %arg2[%c5, %c0_30, %c0_31] : memref<9x4x4xf32, #tpu.memory_space<vmem>>, vector<1x4x4xf32>
    %33 = vector.shape_cast %32 : vector<1x4x4xf32> to vector<4x4xf32>
    %c0_32 = arith.constant 0 : index
    %c0_33 = arith.constant 0 : index
    %c20 = arith.constant 20 : index
    %34 = vector.load %arg1[%c0_32, %c0_33, %c20] : memref<1x4x362xf32, #tpu.memory_space<vmem>>, vector<1x4x324xf32>
    %35 = vector.shape_cast %34 : vector<1x4x324xf32> to vector<4x324xf32>
    %cst_34 = arith.constant dense<0.000000e+00> : vector<4x324xf32>
    %36 = tpu.matmul %33, %35, %cst_34 {dimension_numbers = #tpu.dot_dimension_numbers<[1], [0], [0], [1], [0, 0, 1, 1], [], []>} : vector<4x4xf32>, vector<4x324xf32>, vector<4x324xf32> -> vector<4x324xf32>
    %37 = arith.addf %31, %36 : vector<4x324xf32>
    %c6 = arith.constant 6 : index
    %c0_35 = arith.constant 0 : index
    %c0_36 = arith.constant 0 : index
    %38 = vector.load %arg2[%c6, %c0_35, %c0_36] : memref<9x4x4xf32, #tpu.memory_space<vmem>>, vector<1x4x4xf32>
    %39 = vector.shape_cast %38 : vector<1x4x4xf32> to vector<4x4xf32>
    %c0_37 = arith.constant 0 : index
    %c0_38 = arith.constant 0 : index
    %c36 = arith.constant 36 : index
    %40 = vector.load %arg1[%c0_37, %c0_38, %c36] : memref<1x4x362xf32, #tpu.memory_space<vmem>>, vector<1x4x324xf32>
    %41 = vector.shape_cast %40 : vector<1x4x324xf32> to vector<4x324xf32>
    %cst_39 = arith.constant dense<0.000000e+00> : vector<4x324xf32>
    %42 = tpu.matmul %39, %41, %cst_39 {dimension_numbers = #tpu.dot_dimension_numbers<[1], [0], [0], [1], [0, 0, 1, 1], [], []>} : vector<4x4xf32>, vector<4x324xf32>, vector<4x324xf32> -> vector<4x324xf32>
    %43 = arith.addf %37, %42 : vector<4x324xf32>
    %c7 = arith.constant 7 : index
    %c0_40 = arith.constant 0 : index
    %c0_41 = arith.constant 0 : index
    %44 = vector.load %arg2[%c7, %c0_40, %c0_41] : memref<9x4x4xf32, #tpu.memory_space<vmem>>, vector<1x4x4xf32>
    %45 = vector.shape_cast %44 : vector<1x4x4xf32> to vector<4x4xf32>
    %c0_42 = arith.constant 0 : index
    %c0_43 = arith.constant 0 : index
    %c37 = arith.constant 37 : index
    %46 = vector.load %arg1[%c0_42, %c0_43, %c37] : memref<1x4x362xf32, #tpu.memory_space<vmem>>, vector<1x4x324xf32>
    %47 = vector.shape_cast %46 : vector<1x4x324xf32> to vector<4x324xf32>
    %cst_44 = arith.constant dense<0.000000e+00> : vector<4x324xf32>
    %48 = tpu.matmul %45, %47, %cst_44 {dimension_numbers = #tpu.dot_dimension_numbers<[1], [0], [0], [1], [0, 0, 1, 1], [], []>} : vector<4x4xf32>, vector<4x324xf32>, vector<4x324xf32> -> vector<4x324xf32>
    %49 = arith.addf %43, %48 : vector<4x324xf32>
    %c8 = arith.constant 8 : index
    %c0_45 = arith.constant 0 : index
    %c0_46 = arith.constant 0 : index
    %50 = vector.load %arg2[%c8, %c0_45, %c0_46] : memref<9x4x4xf32, #tpu.memory_space<vmem>>, vector<1x4x4xf32>
    %51 = vector.shape_cast %50 : vector<1x4x4xf32> to vector<4x4xf32>
    %c0_47 = arith.constant 0 : index
    %c0_48 = arith.constant 0 : index
    %c38 = arith.constant 38 : index
    %52 = vector.load %arg1[%c0_47, %c0_48, %c38] : memref<1x4x362xf32, #tpu.memory_space<vmem>>, vector<1x4x324xf32>
    %53 = vector.shape_cast %52 : vector<1x4x324xf32> to vector<4x324xf32>
    %cst_49 = arith.constant dense<0.000000e+00> : vector<4x324xf32>
    %54 = tpu.matmul %51, %53, %cst_49 {dimension_numbers = #tpu.dot_dimension_numbers<[1], [0], [0], [1], [0, 0, 1, 1], [], []>} : vector<4x4xf32>, vector<4x324xf32>, vector<4x324xf32> -> vector<4x324xf32>
    %55 = arith.addf %49, %54 : vector<4x324xf32>
    %cst_50 = arith.constant 0.000000e+00 : f32
    %56 = vector.shape_cast %2 : vector<1x324xi1> to vector<1x324xi1>
    %57 = vector.broadcast %56 : vector<1x324xi1> to vector<4x324xi1>
    %58 = vector.broadcast %cst_50 : f32 to vector<4x324xf32>
    %59 = arith.select %57, %55, %58 : vector<4x324xi1>, vector<4x324xf32>
    %cst_51 = arith.constant dense<0.000000e+00> : vector<4xf32>
    %60 = vector.multi_reduction <add>, %59, %cst_51 [1] : vector<4x324xf32> to vector<4xf32>
    %61 = vector.shape_cast %60 : vector<4xf32> to vector<4x1xf32>
    %cst_52 = arith.constant 3.906250e-03 : f32
    %62 = vector.broadcast %cst_52 : f32 to vector<4x1xf32>
    %63 = arith.mulf %61, %62 : vector<4x1xf32>
    %64 = vector.broadcast %63 : vector<4x1xf32> to vector<4x324xf32>
    %65 = arith.subf %55, %64 : vector<4x324xf32>
    %66 = arith.mulf %65, %65 : vector<4x324xf32>
    %cst_53 = arith.constant 0.000000e+00 : f32
    %67 = vector.shape_cast %2 : vector<1x324xi1> to vector<1x324xi1>
    %68 = vector.broadcast %67 : vector<1x324xi1> to vector<4x324xi1>
    %69 = vector.broadcast %cst_53 : f32 to vector<4x324xf32>
    %70 = arith.select %68, %66, %69 : vector<4x324xi1>, vector<4x324xf32>
    %cst_54 = arith.constant dense<0.000000e+00> : vector<4xf32>
    %71 = vector.multi_reduction <add>, %70, %cst_54 [1] : vector<4x324xf32> to vector<4xf32>
    %72 = vector.shape_cast %71 : vector<4xf32> to vector<4x1xf32>
    %cst_55 = arith.constant 3.906250e-03 : f32
    %73 = vector.broadcast %cst_55 : f32 to vector<4x1xf32>
    %74 = arith.mulf %72, %73 : vector<4x1xf32>
    %cst_56 = arith.constant 9.99999974E-6 : f32
    %75 = vector.broadcast %cst_56 : f32 to vector<4x1xf32>
    %76 = arith.addf %74, %75 : vector<4x1xf32>
    %77 = math.rsqrt %76 : vector<4x1xf32>
    %78 = vector.broadcast %77 : vector<4x1xf32> to vector<4x324xf32>
    %79 = arith.mulf %65, %78 : vector<4x324xf32>
    %cst_57 = arith.constant 0.000000e+00 : f32
    %80 = vector.broadcast %cst_57 : f32 to vector<4x324xf32>
    %81 = arith.maximumf %79, %80 : vector<4x324xf32>
    %cst_58 = arith.constant 0.000000e+00 : f32
    %82 = vector.broadcast %cst_58 : f32 to vector<4x19xf32>
    %c0_59 = arith.constant 0 : index
    %c0_60 = arith.constant 0 : index
    %83 = vector.load %arg6[%c0_59, %c0_60] : memref<4x362xf32, #tpu.memory_space<vmem>>, vector<4x19xf32>
    tpu.vector_store %arg6[%c0_59, %c0_60], %82 {strides = array<i32>} : memref<4x362xf32, #tpu.memory_space<vmem>>, vector<4x19xf32>,
    %cst_61 = arith.constant 0.000000e+00 : f32
    %84 = vector.broadcast %cst_61 : f32 to vector<4x19xf32>
    %c0_62 = arith.constant 0 : index
    %c343 = arith.constant 343 : index
    %85 = vector.load %arg6[%c0_62, %c343] : memref<4x362xf32, #tpu.memory_space<vmem>>, vector<4x19xf32>
    tpu.vector_store %arg6[%c0_62, %c343], %84 {strides = array<i32>} : memref<4x362xf32, #tpu.memory_space<vmem>>, vector<4x19xf32>,
    %c0_63 = arith.constant 0 : index
    %c19_64 = arith.constant 19 : index
    %86 = vector.load %arg6[%c0_63, %c19_64] : memref<4x362xf32, #tpu.memory_space<vmem>>, vector<4x324xf32>
    tpu.vector_store %arg6[%c0_63, %c19_64], %81 {strides = array<i32>} : memref<4x362xf32, #tpu.memory_space<vmem>>, vector<4x324xf32>,
    %c0_65 = arith.constant 0 : index
    %c55 = arith.constant 55 : index
    %87 = vector.load %arg6[%c0_65, %c55] : memref<4x362xf32, #tpu.memory_space<vmem>>, vector<4x18xf32>
    %c0_66 = arith.constant 0 : index
    %c19_67 = arith.constant 19 : index
    %88 = vector.load %arg6[%c0_66, %c19_67] : memref<4x362xf32, #tpu.memory_space<vmem>>, vector<4x18xf32>
    tpu.vector_store %arg6[%c0_66, %c19_67], %87 {strides = array<i32>} : memref<4x362xf32, #tpu.memory_space<vmem>>, vector<4x18xf32>,
    %c0_68 = arith.constant 0 : index
    %c289 = arith.constant 289 : index
    %89 = vector.load %arg6[%c0_68, %c289] : memref<4x362xf32, #tpu.memory_space<vmem>>, vector<4x18xf32>
    %c0_69 = arith.constant 0 : index
    %c325 = arith.constant 325 : index
    %90 = vector.load %arg6[%c0_69, %c325] : memref<4x362xf32, #tpu.memory_space<vmem>>, vector<4x18xf32>
    tpu.vector_store %arg6[%c0_69, %c325], %89 {strides = array<i32>} : memref<4x362xf32, #tpu.memory_space<vmem>>, vector<4x18xf32>,
    %c0_70 = arith.constant 0 : index
    %c21 = arith.constant 21 : index
    %91 = vector.load %arg6[%c0_70, %c21] : memref<4x362xf32, #tpu.memory_space<vmem>>, vector<4x1xf32>
    %c0_71 = arith.constant 0 : index
    %c19_72 = arith.constant 19 : index
    %92 = vector.load %arg6[%c0_71, %c19_72] : memref<4x362xf32, #tpu.memory_space<vmem>>, vector<4x1xf32>
    tpu.vector_store %arg6[%c0_71, %c19_72], %91 {strides = array<i32>} : memref<4x362xf32, #tpu.memory_space<vmem>>, vector<4x1xf32>,
    %c0_73 = arith.constant 0 : index
    %c34 = arith.constant 34 : index
    %93 = vector.load %arg6[%c0_73, %c34] : memref<4x362xf32, #tpu.memory_space<vmem>>, vector<4x1xf32>
    %c0_74 = arith.constant 0 : index
    %c36_75 = arith.constant 36 : index
    %94 = vector.load %arg6[%c0_74, %c36_75] : memref<4x362xf32, #tpu.memory_space<vmem>>, vector<4x1xf32>
    tpu.vector_store %arg6[%c0_74, %c36_75], %93 {strides = array<i32>} : memref<4x362xf32, #tpu.memory_space<vmem>>, vector<4x1xf32>,
    %c0_76 = arith.constant 0 : index
    %c39 = arith.constant 39 : index
    %95 = vector.load %arg6[%c0_76, %c39] : memref<4x362xf32, #tpu.memory_space<vmem>>, vector<4x1xf32>
    %c0_77 = arith.constant 0 : index
    %c37_78 = arith.constant 37 : index
    %96 = vector.load %arg6[%c0_77, %c37_78] : memref<4x362xf32, #tpu.memory_space<vmem>>, vector<4x1xf32>
    tpu.vector_store %arg6[%c0_77, %c37_78], %95 {strides = array<i32>} : memref<4x362xf32, #tpu.memory_space<vmem>>, vector<4x1xf32>,
    %c0_79 = arith.constant 0 : index
    %c52 = arith.constant 52 : index
    %97 = vector.load %arg6[%c0_79, %c52] : memref<4x362xf32, #tpu.memory_space<vmem>>, vector<4x1xf32>
    %c0_80 = arith.constant 0 : index
    %c54 = arith.constant 54 : index
    %98 = vector.load %arg6[%c0_80, %c54] : memref<4x362xf32, #tpu.memory_space<vmem>>, vector<4x1xf32>
    tpu.vector_store %arg6[%c0_80, %c54], %97 {strides = array<i32>} : memref<4x362xf32, #tpu.memory_space<vmem>>, vector<4x1xf32>,
    %c0_81 = arith.constant 0 : index
    %c57 = arith.constant 57 : index
    %99 = vector.load %arg6[%c0_81, %c57] : memref<4x362xf32, #tpu.memory_space<vmem>>, vector<4x1xf32>
    %c0_82 = arith.constant 0 : index
    %c55_83 = arith.constant 55 : index
    %100 = vector.load %arg6[%c0_82, %c55_83] : memref<4x362xf32, #tpu.memory_space<vmem>>, vector<4x1xf32>
    tpu.vector_store %arg6[%c0_82, %c55_83], %99 {strides = array<i32>} : memref<4x362xf32, #tpu.memory_space<vmem>>, vector<4x1xf32>,
    %c0_84 = arith.constant 0 : index
    %c70 = arith.constant 70 : index
    %101 = vector.load %arg6[%c0_84, %c70] : memref<4x362xf32, #tpu.memory_space<vmem>>, vector<4x1xf32>
    %c0_85 = arith.constant 0 : index
    %c72 = arith.constant 72 : index
    %102 = vector.load %arg6[%c0_85, %c72] : memref<4x362xf32, #tpu.memory_space<vmem>>, vector<4x1xf32>
    tpu.vector_store %arg6[%c0_85, %c72], %101 {strides = array<i32>} : memref<4x362xf32, #tpu.memory_space<vmem>>, vector<4x1xf32>,
    %c0_86 = arith.constant 0 : index
    %c75 = arith.constant 75 : index
    %103 = vector.load %arg6[%c0_86, %c75] : memref<4x362xf32, #tpu.memory_space<vmem>>, vector<4x1xf32>
    %c0_87 = arith.constant 0 : index
    %c73 = arith.constant 73 : index
    %104 = vector.load %arg6[%c0_87, %c73] : memref<4x362xf32, #tpu.memory_space<vmem>>, vector<4x1xf32>
    tpu.vector_store %arg6[%c0_87, %c73], %103 {strides = array<i32>} : memref<4x362xf32, #tpu.memory_space<vmem>>, vector<4x1xf32>,
    %c0_88 = arith.constant 0 : index
    %c88 = arith.constant 88 : index
    %105 = vector.load %arg6[%c0_88, %c88] : memref<4x362xf32, #tpu.memory_space<vmem>>, vector<4x1xf32>
    %c0_89 = arith.constant 0 : index
    %c90 = arith.constant 90 : index
    %106 = vector.load %arg6[%c0_89, %c90] : memref<4x362xf32, #tpu.memory_space<vmem>>, vector<4x1xf32>
    tpu.vector_store %arg6[%c0_89, %c90], %105 {strides = array<i32>} : memref<4x362xf32, #tpu.memory_space<vmem>>, vector<4x1xf32>,
    %c0_90 = arith.constant 0 : index
    %c93 = arith.constant 93 : index
    %107 = vector.load %arg6[%c0_90, %c93] : memref<4x362xf32, #tpu.memory_space<vmem>>, vector<4x1xf32>
    %c0_91 = arith.constant 0 : index
    %c91 = arith.constant 91 : index
    %108 = vector.load %arg6[%c0_91, %c91] : memref<4x362xf32, #tpu.memory_space<vmem>>, vector<4x1xf32>
    tpu.vector_store %arg6[%c0_91, %c91], %107 {strides = array<i32>} : memref<4x362xf32, #tpu.memory_space<vmem>>, vector<4x1xf32>,
    %c0_92 = arith.constant 0 : index
    %c106 = arith.constant 106 : index
    %109 = vector.load %arg6[%c0_92, %c106] : memref<4x362xf32, #tpu.memory_space<vmem>>, vector<4x1xf32>
    %c0_93 = arith.constant 0 : index
    %c108 = arith.constant 108 : index
    %110 = vector.load %arg6[%c0_93, %c108] : memref<4x362xf32, #tpu.memory_space<vmem>>, vector<4x1xf32>
    tpu.vector_store %arg6[%c0_93, %c108], %109 {strides = array<i32>} : memref<4x362xf32, #tpu.memory_space<vmem>>, vector<4x1xf32>,
    %c0_94 = arith.constant 0 : index
    %c111 = arith.constant 111 : index
    %111 = vector.load %arg6[%c0_94, %c111] : memref<4x362xf32, #tpu.memory_space<vmem>>, vector<4x1xf32>
    %c0_95 = arith.constant 0 : index
    %c109 = arith.constant 109 : index
    %112 = vector.load %arg6[%c0_95, %c109] : memref<4x362xf32, #tpu.memory_space<vmem>>, vector<4x1xf32>
    tpu.vector_store %arg6[%c0_95, %c109], %111 {strides = array<i32>} : memref<4x362xf32, #tpu.memory_space<vmem>>, vector<4x1xf32>,
    %c0_96 = arith.constant 0 : index
    %c124 = arith.constant 124 : index
    %113 = vector.load %arg6[%c0_96, %c124] : memref<4x362xf32, #tpu.memory_space<vmem>>, vector<4x1xf32>
    %c0_97 = arith.constant 0 : index
    %c126 = arith.constant 126 : index
    %114 = vector.load %arg6[%c0_97, %c126] : memref<4x362xf32, #tpu.memory_space<vmem>>, vector<4x1xf32>
    tpu.vector_store %arg6[%c0_97, %c126], %113 {strides = array<i32>} : memref<4x362xf32, #tpu.memory_space<vmem>>, vector<4x1xf32>,
    %c0_98 = arith.constant 0 : index
    %c129 = arith.constant 129 : index
    %115 = vector.load %arg6[%c0_98, %c129] : memref<4x362xf32, #tpu.memory_space<vmem>>, vector<4x1xf32>
    %c0_99 = arith.constant 0 : index
    %c127 = arith.constant 127 : index
    %116 = vector.load %arg6[%c0_99, %c127] : memref<4x362xf32, #tpu.memory_space<vmem>>, vector<4x1xf32>
    tpu.vector_store %arg6[%c0_99, %c127], %115 {strides = array<i32>} : memref<4x362xf32, #tpu.memory_space<vmem>>, vector<4x1xf32>,
    %c0_100 = arith.constant 0 : index
    %c142 = arith.constant 142 : index
    %117 = vector.load %arg6[%c0_100, %c142] : memref<4x362xf32, #tpu.memory_space<vmem>>, vector<4x1xf32>
    %c0_101 = arith.constant 0 : index
    %c144 = arith.constant 144 : index
    %118 = vector.load %arg6[%c0_101, %c144] : memref<4x362xf32, #tpu.memory_space<vmem>>, vector<4x1xf32>
    tpu.vector_store %arg6[%c0_101, %c144], %117 {strides = array<i32>} : memref<4x362xf32, #tpu.memory_space<vmem>>, vector<4x1xf32>,
    %c0_102 = arith.constant 0 : index
    %c147 = arith.constant 147 : index
    %119 = vector.load %arg6[%c0_102, %c147] : memref<4x362xf32, #tpu.memory_space<vmem>>, vector<4x1xf32>
    %c0_103 = arith.constant 0 : index
    %c145 = arith.constant 145 : index
    %120 = vector.load %arg6[%c0_103, %c145] : memref<4x362xf32, #tpu.memory_space<vmem>>, vector<4x1xf32>
    tpu.vector_store %arg6[%c0_103, %c145], %119 {strides = array<i32>} : memref<4x362xf32, #tpu.memory_space<vmem>>, vector<4x1xf32>,
    %c0_104 = arith.constant 0 : index
    %c160 = arith.constant 160 : index
    %121 = vector.load %arg6[%c0_104, %c160] : memref<4x362xf32, #tpu.memory_space<vmem>>, vector<4x1xf32>
    %c0_105 = arith.constant 0 : index
    %c162 = arith.constant 162 : index
    %122 = vector.load %arg6[%c0_105, %c162] : memref<4x362xf32, #tpu.memory_space<vmem>>, vector<4x1xf32>
    tpu.vector_store %arg6[%c0_105, %c162], %121 {strides = array<i32>} : memref<4x362xf32, #tpu.memory_space<vmem>>, vector<4x1xf32>,
    %c0_106 = arith.constant 0 : index
    %c165 = arith.constant 165 : index
    %123 = vector.load %arg6[%c0_106, %c165] : memref<4x362xf32, #tpu.memory_space<vmem>>, vector<4x1xf32>
    %c0_107 = arith.constant 0 : index
    %c163 = arith.constant 163 : index
    %124 = vector.load %arg6[%c0_107, %c163] : memref<4x362xf32, #tpu.memory_space<vmem>>, vector<4x1xf32>
    tpu.vector_store %arg6[%c0_107, %c163], %123 {strides = array<i32>} : memref<4x362xf32, #tpu.memory_space<vmem>>, vector<4x1xf32>,
    %c0_108 = arith.constant 0 : index
    %c178 = arith.constant 178 : index
    %125 = vector.load %arg6[%c0_108, %c178] : memref<4x362xf32, #tpu.memory_space<vmem>>, vector<4x1xf32>
    %c0_109 = arith.constant 0 : index
    %c180 = arith.constant 180 : index
    %126 = vector.load %arg6[%c0_109, %c180] : memref<4x362xf32, #tpu.memory_space<vmem>>, vector<4x1xf32>
    tpu.vector_store %arg6[%c0_109, %c180], %125 {strides = array<i32>} : memref<4x362xf32, #tpu.memory_space<vmem>>, vector<4x1xf32>,
    %c0_110 = arith.constant 0 : index
    %c183 = arith.constant 183 : index
    %127 = vector.load %arg6[%c0_110, %c183] : memref<4x362xf32, #tpu.memory_space<vmem>>, vector<4x1xf32>
    %c0_111 = arith.constant 0 : index
    %c181 = arith.constant 181 : index
    %128 = vector.load %arg6[%c0_111, %c181] : memref<4x362xf32, #tpu.memory_space<vmem>>, vector<4x1xf32>
    tpu.vector_store %arg6[%c0_111, %c181], %127 {strides = array<i32>} : memref<4x362xf32, #tpu.memory_space<vmem>>, vector<4x1xf32>,
    %c0_112 = arith.constant 0 : index
    %c196 = arith.constant 196 : index
    %129 = vector.load %arg6[%c0_112, %c196] : memref<4x362xf32, #tpu.memory_space<vmem>>, vector<4x1xf32>
    %c0_113 = arith.constant 0 : index
    %c198 = arith.constant 198 : index
    %130 = vector.load %arg6[%c0_113, %c198] : memref<4x362xf32, #tpu.memory_space<vmem>>, vector<4x1xf32>
    tpu.vector_store %arg6[%c0_113, %c198], %129 {strides = array<i32>} : memref<4x362xf32, #tpu.memory_space<vmem>>, vector<4x1xf32>,
    %c0_114 = arith.constant 0 : index
    %c201 = arith.constant 201 : index
    %131 = vector.load %arg6[%c0_114, %c201] : memref<4x362xf32, #tpu.memory_space<vmem>>, vector<4x1xf32>
    %c0_115 = arith.constant 0 : index
    %c199 = arith.constant 199 : index
    %132 = vector.load %arg6[%c0_115, %c199] : memref<4x362xf32, #tpu.memory_space<vmem>>, vector<4x1xf32>
    tpu.vector_store %arg6[%c0_115, %c199], %131 {strides = array<i32>} : memref<4x362xf32, #tpu.memory_space<vmem>>, vector<4x1xf32>,
    %c0_116 = arith.constant 0 : index
    %c214 = arith.constant 214 : index
    %133 = vector.load %arg6[%c0_116, %c214] : memref<4x362xf32, #tpu.memory_space<vmem>>, vector<4x1xf32>
    %c0_117 = arith.constant 0 : index
    %c216 = arith.constant 216 : index
    %134 = vector.load %arg6[%c0_117, %c216] : memref<4x362xf32, #tpu.memory_space<vmem>>, vector<4x1xf32>
    tpu.vector_store %arg6[%c0_117, %c216], %133 {strides = array<i32>} : memref<4x362xf32, #tpu.memory_space<vmem>>, vector<4x1xf32>,
    %c0_118 = arith.constant 0 : index
    %c219 = arith.constant 219 : index
    %135 = vector.load %arg6[%c0_118, %c219] : memref<4x362xf32, #tpu.memory_space<vmem>>, vector<4x1xf32>
    %c0_119 = arith.constant 0 : index
    %c217 = arith.constant 217 : index
    %136 = vector.load %arg6[%c0_119, %c217] : memref<4x362xf32, #tpu.memory_space<vmem>>, vector<4x1xf32>
    tpu.vector_store %arg6[%c0_119, %c217], %135 {strides = array<i32>} : memref<4x362xf32, #tpu.memory_space<vmem>>, vector<4x1xf32>,
    %c0_120 = arith.constant 0 : index
    %c232 = arith.constant 232 : index
    %137 = vector.load %arg6[%c0_120, %c232] : memref<4x362xf32, #tpu.memory_space<vmem>>, vector<4x1xf32>
    %c0_121 = arith.constant 0 : index
    %c234 = arith.constant 234 : index
    %138 = vector.load %arg6[%c0_121, %c234] : memref<4x362xf32, #tpu.memory_space<vmem>>, vector<4x1xf32>
    tpu.vector_store %arg6[%c0_121, %c234], %137 {strides = array<i32>} : memref<4x362xf32, #tpu.memory_space<vmem>>, vector<4x1xf32>,
    %c0_122 = arith.constant 0 : index
    %c237 = arith.constant 237 : index
    %139 = vector.load %arg6[%c0_122, %c237] : memref<4x362xf32, #tpu.memory_space<vmem>>, vector<4x1xf32>
    %c0_123 = arith.constant 0 : index
    %c235 = arith.constant 235 : index
    %140 = vector.load %arg6[%c0_123, %c235] : memref<4x362xf32, #tpu.memory_space<vmem>>, vector<4x1xf32>
    tpu.vector_store %arg6[%c0_123, %c235], %139 {strides = array<i32>} : memref<4x362xf32, #tpu.memory_space<vmem>>, vector<4x1xf32>,
    %c0_124 = arith.constant 0 : index
    %c250 = arith.constant 250 : index
    %141 = vector.load %arg6[%c0_124, %c250] : memref<4x362xf32, #tpu.memory_space<vmem>>, vector<4x1xf32>
    %c0_125 = arith.constant 0 : index
    %c252 = arith.constant 252 : index
    %142 = vector.load %arg6[%c0_125, %c252] : memref<4x362xf32, #tpu.memory_space<vmem>>, vector<4x1xf32>
    tpu.vector_store %arg6[%c0_125, %c252], %141 {strides = array<i32>} : memref<4x362xf32, #tpu.memory_space<vmem>>, vector<4x1xf32>,
    %c0_126 = arith.constant 0 : index
    %c255 = arith.constant 255 : index
    %143 = vector.load %arg6[%c0_126, %c255] : memref<4x362xf32, #tpu.memory_space<vmem>>, vector<4x1xf32>
    %c0_127 = arith.constant 0 : index
    %c253 = arith.constant 253 : index
    %144 = vector.load %arg6[%c0_127, %c253] : memref<4x362xf32, #tpu.memory_space<vmem>>, vector<4x1xf32>
    tpu.vector_store %arg6[%c0_127, %c253], %143 {strides = array<i32>} : memref<4x362xf32, #tpu.memory_space<vmem>>, vector<4x1xf32>,
    %c0_128 = arith.constant 0 : index
    %c268 = arith.constant 268 : index
    %145 = vector.load %arg6[%c0_128, %c268] : memref<4x362xf32, #tpu.memory_space<vmem>>, vector<4x1xf32>
    %c0_129 = arith.constant 0 : index
    %c270 = arith.constant 270 : index
    %146 = vector.load %arg6[%c0_129, %c270] : memref<4x362xf32, #tpu.memory_space<vmem>>, vector<4x1xf32>
    tpu.vector_store %arg6[%c0_129, %c270], %145 {strides = array<i32>} : memref<4x362xf32, #tpu.memory_space<vmem>>, vector<4x1xf32>,
    %c0_130 = arith.constant 0 : index
    %c273 = arith.constant 273 : index
    %147 = vector.load %arg6[%c0_130, %c273] : memref<4x362xf32, #tpu.memory_space<vmem>>, vector<4x1xf32>
    %c0_131 = arith.constant 0 : index
    %c271 = arith.constant 271 : index
    %148 = vector.load %arg6[%c0_131, %c271] : memref<4x362xf32, #tpu.memory_space<vmem>>, vector<4x1xf32>
    tpu.vector_store %arg6[%c0_131, %c271], %147 {strides = array<i32>} : memref<4x362xf32, #tpu.memory_space<vmem>>, vector<4x1xf32>,
    %c0_132 = arith.constant 0 : index
    %c286 = arith.constant 286 : index
    %149 = vector.load %arg6[%c0_132, %c286] : memref<4x362xf32, #tpu.memory_space<vmem>>, vector<4x1xf32>
    %c0_133 = arith.constant 0 : index
    %c288 = arith.constant 288 : index
    %150 = vector.load %arg6[%c0_133, %c288] : memref<4x362xf32, #tpu.memory_space<vmem>>, vector<4x1xf32>
    tpu.vector_store %arg6[%c0_133, %c288], %149 {strides = array<i32>} : memref<4x362xf32, #tpu.memory_space<vmem>>, vector<4x1xf32>,
    %c0_134 = arith.constant 0 : index
    %c291 = arith.constant 291 : index
    %151 = vector.load %arg6[%c0_134, %c291] : memref<4x362xf32, #tpu.memory_space<vmem>>, vector<4x1xf32>
    %c0_135 = arith.constant 0 : index
    %c289_136 = arith.constant 289 : index
    %152 = vector.load %arg6[%c0_135, %c289_136] : memref<4x362xf32, #tpu.memory_space<vmem>>, vector<4x1xf32>
    tpu.vector_store %arg6[%c0_135, %c289_136], %151 {strides = array<i32>} : memref<4x362xf32, #tpu.memory_space<vmem>>, vector<4x1xf32>,
    %c0_137 = arith.constant 0 : index
    %c304 = arith.constant 304 : index
    %153 = vector.load %arg6[%c0_137, %c304] : memref<4x362xf32, #tpu.memory_space<vmem>>, vector<4x1xf32>
    %c0_138 = arith.constant 0 : index
    %c306 = arith.constant 306 : index
    %154 = vector.load %arg6[%c0_138, %c306] : memref<4x362xf32, #tpu.memory_space<vmem>>, vector<4x1xf32>
    tpu.vector_store %arg6[%c0_138, %c306], %153 {strides = array<i32>} : memref<4x362xf32, #tpu.memory_space<vmem>>, vector<4x1xf32>,
    %c0_139 = arith.constant 0 : index
    %c309 = arith.constant 309 : index
    %155 = vector.load %arg6[%c0_139, %c309] : memref<4x362xf32, #tpu.memory_space<vmem>>, vector<4x1xf32>
    %c0_140 = arith.constant 0 : index
    %c307 = arith.constant 307 : index
    %156 = vector.load %arg6[%c0_140, %c307] : memref<4x362xf32, #tpu.memory_space<vmem>>, vector<4x1xf32>
    tpu.vector_store %arg6[%c0_140, %c307], %155 {strides = array<i32>} : memref<4x362xf32, #tpu.memory_space<vmem>>, vector<4x1xf32>,
    %c0_141 = arith.constant 0 : index
    %c322 = arith.constant 322 : index
    %157 = vector.load %arg6[%c0_141, %c322] : memref<4x362xf32, #tpu.memory_space<vmem>>, vector<4x1xf32>
    %c0_142 = arith.constant 0 : index
    %c324 = arith.constant 324 : index
    %158 = vector.load %arg6[%c0_142, %c324] : memref<4x362xf32, #tpu.memory_space<vmem>>, vector<4x1xf32>
    tpu.vector_store %arg6[%c0_142, %c324], %157 {strides = array<i32>} : memref<4x362xf32, #tpu.memory_space<vmem>>, vector<4x1xf32>,
    %c0_143 = arith.constant 0 : index
    %c327 = arith.constant 327 : index
    %159 = vector.load %arg6[%c0_143, %c327] : memref<4x362xf32, #tpu.memory_space<vmem>>, vector<4x1xf32>
    %c0_144 = arith.constant 0 : index
    %c325_145 = arith.constant 325 : index
    %160 = vector.load %arg6[%c0_144, %c325_145] : memref<4x362xf32, #tpu.memory_space<vmem>>, vector<4x1xf32>
    tpu.vector_store %arg6[%c0_144, %c325_145], %159 {strides = array<i32>} : memref<4x362xf32, #tpu.memory_space<vmem>>, vector<4x1xf32>,
    %c0_146 = arith.constant 0 : index
    %c340 = arith.constant 340 : index
    %161 = vector.load %arg6[%c0_146, %c340] : memref<4x362xf32, #tpu.memory_space<vmem>>, vector<4x1xf32>
    %c0_147 = arith.constant 0 : index
    %c342 = arith.constant 342 : index
    %162 = vector.load %arg6[%c0_147, %c342] : memref<4x362xf32, #tpu.memory_space<vmem>>, vector<4x1xf32>
    tpu.vector_store %arg6[%c0_147, %c342], %161 {strides = array<i32>} : memref<4x362xf32, #tpu.memory_space<vmem>>, vector<4x1xf32>,
    %c0_148 = arith.constant 0 : index
    %c0_149 = arith.constant 0 : index
    %c0_150 = arith.constant 0 : index
    %163 = vector.load %arg3[%c0_148, %c0_149, %c0_150] : memref<9x4x4xf32, #tpu.memory_space<vmem>>, vector<1x4x4xf32>
    %164 = vector.shape_cast %163 : vector<1x4x4xf32> to vector<4x4xf32>
    %c0_151 = arith.constant 0 : index
    %c0_152 = arith.constant 0 : index
    %165 = vector.load %arg6[%c0_151, %c0_152] : memref<4x362xf32, #tpu.memory_space<vmem>>, vector<4x324xf32>
    %cst_153 = arith.constant dense<0.000000e+00> : vector<4x324xf32>
    %166 = tpu.matmul %164, %165, %cst_153 {dimension_numbers = #tpu.dot_dimension_numbers<[1], [0], [0], [1], [0, 0, 1, 1], [], []>} : vector<4x4xf32>, vector<4x324xf32>, vector<4x324xf32> -> vector<4x324xf32>
    %c1_154 = arith.constant 1 : index
    %c0_155 = arith.constant 0 : index
    %c0_156 = arith.constant 0 : index
    %167 = vector.load %arg3[%c1_154, %c0_155, %c0_156] : memref<9x4x4xf32, #tpu.memory_space<vmem>>, vector<1x4x4xf32>
    %168 = vector.shape_cast %167 : vector<1x4x4xf32> to vector<4x4xf32>
    %c0_157 = arith.constant 0 : index
    %c1_158 = arith.constant 1 : index
    %169 = vector.load %arg6[%c0_157, %c1_158] : memref<4x362xf32, #tpu.memory_space<vmem>>, vector<4x324xf32>
    %cst_159 = arith.constant dense<0.000000e+00> : vector<4x324xf32>
    %170 = tpu.matmul %168, %169, %cst_159 {dimension_numbers = #tpu.dot_dimension_numbers<[1], [0], [0], [1], [0, 0, 1, 1], [], []>} : vector<4x4xf32>, vector<4x324xf32>, vector<4x324xf32> -> vector<4x324xf32>
    %171 = arith.addf %166, %170 : vector<4x324xf32>
    %c2_160 = arith.constant 2 : index
    %c0_161 = arith.constant 0 : index
    %c0_162 = arith.constant 0 : index
    %172 = vector.load %arg3[%c2_160, %c0_161, %c0_162] : memref<9x4x4xf32, #tpu.memory_space<vmem>>, vector<1x4x4xf32>
    %173 = vector.shape_cast %172 : vector<1x4x4xf32> to vector<4x4xf32>
    %c0_163 = arith.constant 0 : index
    %c2_164 = arith.constant 2 : index
    %174 = vector.load %arg6[%c0_163, %c2_164] : memref<4x362xf32, #tpu.memory_space<vmem>>, vector<4x324xf32>
    %cst_165 = arith.constant dense<0.000000e+00> : vector<4x324xf32>
    %175 = tpu.matmul %173, %174, %cst_165 {dimension_numbers = #tpu.dot_dimension_numbers<[1], [0], [0], [1], [0, 0, 1, 1], [], []>} : vector<4x4xf32>, vector<4x324xf32>, vector<4x324xf32> -> vector<4x324xf32>
    %176 = arith.addf %171, %175 : vector<4x324xf32>
    %c3_166 = arith.constant 3 : index
    %c0_167 = arith.constant 0 : index
    %c0_168 = arith.constant 0 : index
    %177 = vector.load %arg3[%c3_166, %c0_167, %c0_168] : memref<9x4x4xf32, #tpu.memory_space<vmem>>, vector<1x4x4xf32>
    %178 = vector.shape_cast %177 : vector<1x4x4xf32> to vector<4x4xf32>
    %c0_169 = arith.constant 0 : index
    %c18_170 = arith.constant 18 : index
    %179 = vector.load %arg6[%c0_169, %c18_170] : memref<4x362xf32, #tpu.memory_space<vmem>>, vector<4x324xf32>
    %cst_171 = arith.constant dense<0.000000e+00> : vector<4x324xf32>
    %180 = tpu.matmul %178, %179, %cst_171 {dimension_numbers = #tpu.dot_dimension_numbers<[1], [0], [0], [1], [0, 0, 1, 1], [], []>} : vector<4x4xf32>, vector<4x324xf32>, vector<4x324xf32> -> vector<4x324xf32>
    %181 = arith.addf %176, %180 : vector<4x324xf32>
    %c4_172 = arith.constant 4 : index
    %c0_173 = arith.constant 0 : index
    %c0_174 = arith.constant 0 : index
    %182 = vector.load %arg3[%c4_172, %c0_173, %c0_174] : memref<9x4x4xf32, #tpu.memory_space<vmem>>, vector<1x4x4xf32>
    %183 = vector.shape_cast %182 : vector<1x4x4xf32> to vector<4x4xf32>
    %c0_175 = arith.constant 0 : index
    %c19_176 = arith.constant 19 : index
    %184 = vector.load %arg6[%c0_175, %c19_176] : memref<4x362xf32, #tpu.memory_space<vmem>>, vector<4x324xf32>
    %cst_177 = arith.constant dense<0.000000e+00> : vector<4x324xf32>
    %185 = tpu.matmul %183, %184, %cst_177 {dimension_numbers = #tpu.dot_dimension_numbers<[1], [0], [0], [1], [0, 0, 1, 1], [], []>} : vector<4x4xf32>, vector<4x324xf32>, vector<4x324xf32> -> vector<4x324xf32>
    %186 = arith.addf %181, %185 : vector<4x324xf32>
    %c5_178 = arith.constant 5 : index
    %c0_179 = arith.constant 0 : index
    %c0_180 = arith.constant 0 : index
    %187 = vector.load %arg3[%c5_178, %c0_179, %c0_180] : memref<9x4x4xf32, #tpu.memory_space<vmem>>, vector<1x4x4xf32>
    %188 = vector.shape_cast %187 : vector<1x4x4xf32> to vector<4x4xf32>
    %c0_181 = arith.constant 0 : index
    %c20_182 = arith.constant 20 : index
    %189 = vector.load %arg6[%c0_181, %c20_182] : memref<4x362xf32, #tpu.memory_space<vmem>>, vector<4x324xf32>
    %cst_183 = arith.constant dense<0.000000e+00> : vector<4x324xf32>
    %190 = tpu.matmul %188, %189, %cst_183 {dimension_numbers = #tpu.dot_dimension_numbers<[1], [0], [0], [1], [0, 0, 1, 1], [], []>} : vector<4x4xf32>, vector<4x324xf32>, vector<4x324xf32> -> vector<4x324xf32>
    %191 = arith.addf %186, %190 : vector<4x324xf32>
    %c6_184 = arith.constant 6 : index
    %c0_185 = arith.constant 0 : index
    %c0_186 = arith.constant 0 : index
    %192 = vector.load %arg3[%c6_184, %c0_185, %c0_186] : memref<9x4x4xf32, #tpu.memory_space<vmem>>, vector<1x4x4xf32>
    %193 = vector.shape_cast %192 : vector<1x4x4xf32> to vector<4x4xf32>
    %c0_187 = arith.constant 0 : index
    %c36_188 = arith.constant 36 : index
    %194 = vector.load %arg6[%c0_187, %c36_188] : memref<4x362xf32, #tpu.memory_space<vmem>>, vector<4x324xf32>
    %cst_189 = arith.constant dense<0.000000e+00> : vector<4x324xf32>
    %195 = tpu.matmul %193, %194, %cst_189 {dimension_numbers = #tpu.dot_dimension_numbers<[1], [0], [0], [1], [0, 0, 1, 1], [], []>} : vector<4x4xf32>, vector<4x324xf32>, vector<4x324xf32> -> vector<4x324xf32>
    %196 = arith.addf %191, %195 : vector<4x324xf32>
    %c7_190 = arith.constant 7 : index
    %c0_191 = arith.constant 0 : index
    %c0_192 = arith.constant 0 : index
    %197 = vector.load %arg3[%c7_190, %c0_191, %c0_192] : memref<9x4x4xf32, #tpu.memory_space<vmem>>, vector<1x4x4xf32>
    %198 = vector.shape_cast %197 : vector<1x4x4xf32> to vector<4x4xf32>
    %c0_193 = arith.constant 0 : index
    %c37_194 = arith.constant 37 : index
    %199 = vector.load %arg6[%c0_193, %c37_194] : memref<4x362xf32, #tpu.memory_space<vmem>>, vector<4x324xf32>
    %cst_195 = arith.constant dense<0.000000e+00> : vector<4x324xf32>
    %200 = tpu.matmul %198, %199, %cst_195 {dimension_numbers = #tpu.dot_dimension_numbers<[1], [0], [0], [1], [0, 0, 1, 1], [], []>} : vector<4x4xf32>, vector<4x324xf32>, vector<4x324xf32> -> vector<4x324xf32>
    %201 = arith.addf %196, %200 : vector<4x324xf32>
    %c8_196 = arith.constant 8 : index
    %c0_197 = arith.constant 0 : index
    %c0_198 = arith.constant 0 : index
    %202 = vector.load %arg3[%c8_196, %c0_197, %c0_198] : memref<9x4x4xf32, #tpu.memory_space<vmem>>, vector<1x4x4xf32>
    %203 = vector.shape_cast %202 : vector<1x4x4xf32> to vector<4x4xf32>
    %c0_199 = arith.constant 0 : index
    %c38_200 = arith.constant 38 : index
    %204 = vector.load %arg6[%c0_199, %c38_200] : memref<4x362xf32, #tpu.memory_space<vmem>>, vector<4x324xf32>
    %cst_201 = arith.constant dense<0.000000e+00> : vector<4x324xf32>
    %205 = tpu.matmul %203, %204, %cst_201 {dimension_numbers = #tpu.dot_dimension_numbers<[1], [0], [0], [1], [0, 0, 1, 1], [], []>} : vector<4x4xf32>, vector<4x324xf32>, vector<4x324xf32> -> vector<4x324xf32>
    %206 = arith.addf %201, %205 : vector<4x324xf32>
    %cst_202 = arith.constant 0.000000e+00 : f32
    %207 = vector.shape_cast %2 : vector<1x324xi1> to vector<1x324xi1>
    %208 = vector.broadcast %207 : vector<1x324xi1> to vector<4x324xi1>
    %209 = vector.broadcast %cst_202 : f32 to vector<4x324xf32>
    %210 = arith.select %208, %206, %209 : vector<4x324xi1>, vector<4x324xf32>
    %cst_203 = arith.constant dense<0.000000e+00> : vector<4xf32>
    %211 = vector.multi_reduction <add>, %210, %cst_203 [1] : vector<4x324xf32> to vector<4xf32>
    %212 = vector.shape_cast %211 : vector<4xf32> to vector<4x1xf32>
    %cst_204 = arith.constant 3.906250e-03 : f32
    %213 = vector.broadcast %cst_204 : f32 to vector<4x1xf32>
    %214 = arith.mulf %212, %213 : vector<4x1xf32>
    %215 = vector.broadcast %214 : vector<4x1xf32> to vector<4x324xf32>
    %216 = arith.subf %206, %215 : vector<4x324xf32>
    %217 = arith.mulf %216, %216 : vector<4x324xf32>
    %cst_205 = arith.constant 0.000000e+00 : f32
    %218 = vector.shape_cast %2 : vector<1x324xi1> to vector<1x324xi1>
    %219 = vector.broadcast %218 : vector<1x324xi1> to vector<4x324xi1>
    %220 = vector.broadcast %cst_205 : f32 to vector<4x324xf32>
    %221 = arith.select %219, %217, %220 : vector<4x324xi1>, vector<4x324xf32>
    %cst_206 = arith.constant dense<0.000000e+00> : vector<4xf32>
    %222 = vector.multi_reduction <add>, %221, %cst_206 [1] : vector<4x324xf32> to vector<4xf32>
    %223 = vector.shape_cast %222 : vector<4xf32> to vector<4x1xf32>
    %cst_207 = arith.constant 3.906250e-03 : f32
    %224 = vector.broadcast %cst_207 : f32 to vector<4x1xf32>
    %225 = arith.mulf %223, %224 : vector<4x1xf32>
    %cst_208 = arith.constant 9.99999974E-6 : f32
    %226 = vector.broadcast %cst_208 : f32 to vector<4x1xf32>
    %227 = arith.addf %225, %226 : vector<4x1xf32>
    %228 = math.rsqrt %227 : vector<4x1xf32>
    %229 = vector.broadcast %228 : vector<4x1xf32> to vector<4x324xf32>
    %230 = arith.mulf %216, %229 : vector<4x324xf32>
    %c0_209 = arith.constant 0 : index
    %c0_210 = arith.constant 0 : index
    %c19_211 = arith.constant 19 : index
    %231 = vector.load %arg1[%c0_209, %c0_210, %c19_211] : memref<1x4x362xf32, #tpu.memory_space<vmem>>, vector<1x4x324xf32>
    %232 = vector.shape_cast %231 : vector<1x4x324xf32> to vector<4x324xf32>
    %233 = arith.addf %230, %232 : vector<4x324xf32>
    %c0_212 = arith.constant 0 : index
    %c0_213 = arith.constant 0 : index
    %c0_214 = arith.constant 0 : index
    %234 = vector.load %arg5[%c0_212, %c0_213, %c0_214] : memref<1x4x324xf32, #tpu.memory_space<vmem>>, vector<1x4x324xf32>
    %235 = vector.shape_cast %234 : vector<1x4x324xf32> to vector<4x324xf32>
    %236 = vector.shape_cast %233 : vector<4x324xf32> to vector<1x4x324xf32>
    tpu.vector_store %arg5[%c0_212, %c0_213, %c0_214], %236 {strides = array<i32>} : memref<1x4x324xf32, #tpu.memory_space<vmem>>, vector<1x4x324xf32>,
    return
  }
  func.func @transform_0(%arg0: i32) -> (i32, i32, i32) {
    %c0_i32 = arith.constant 0 : i32
    %c0_i32_0 = arith.constant 0 : i32
    %c0_i32_1 = arith.constant 0 : i32
    return %arg0, %c0_i32, %c0_i32_0 : i32, i32, i32
  }
  func.func @transform_1(%arg0: i32) -> (i32, i32, i32) {
    %c0_i32 = arith.constant 0 : i32
    %c0_i32_0 = arith.constant 0 : i32
    %c0_i32_1 = arith.constant 0 : i32
    %c0_i32_2 = arith.constant 0 : i32
    return %c0_i32, %c0_i32_0, %c0_i32_1 : i32, i32, i32
  }
  func.func @transform_2(%arg0: i32) -> (i32, i32, i32) {
    %c0_i32 = arith.constant 0 : i32
    %c0_i32_0 = arith.constant 0 : i32
    %c0_i32_1 = arith.constant 0 : i32
    %c0_i32_2 = arith.constant 0 : i32
    return %c0_i32, %c0_i32_0, %c0_i32_1 : i32, i32, i32
  }
  func.func @transform_3(%arg0: i32) -> (i32, i32) {
    %c0_i32 = arith.constant 0 : i32
    %c0_i32_0 = arith.constant 0 : i32
    %c0_i32_1 = arith.constant 0 : i32
    return %c0_i32, %c0_i32_0 : i32, i32
  }
  func.func @transform_4(%arg0: i32) -> (i32, i32, i32) {
    %c0_i32 = arith.constant 0 : i32
    %c0_i32_0 = arith.constant 0 : i32
    %c0_i32_1 = arith.constant 0 : i32
    return %arg0, %c0_i32, %c0_i32_0 : i32, i32, i32
  }
}

</mosaic_0001>

<bundles_post_ra>
// kernel: residual_block_forward.1
= control target key start
LH: loop header
LB: loop body
LE: loop exit
PB: predicated region body
PF: predicated region fallthrough
CT: control target
= control target key end

     0   :  { %s4032_s15 = smov 0   ;;  %s4465_s0 = inlined_call_operand.vmem [shape: f32[2,4,362], index: 0, kind: input, shape index: {}]   ;;  %s4466_s1 = inlined_call_operand.vmem [shape: f32[9,4,4], index: 1, kind: input, shape index: {}]   ;;  %s4467_s2 = inlined_call_operand.vmem [shape: f32[9,4,4], index: 2, kind: input, shape index: {}]   ;;  %s4468_s3 = inlined_call_operand.vmem [shape: f32[1,324], index: 3, kind: input, shape index: {}]   ;;  %s4469_s4 = inlined_call_operand.vmem [shape: f32[2,4,324], index: 4, kind: output, shape index: {}]  }
   0x1 LB: > { %s3650_s16 = sadd.s32 4294967295, %s3991_s15   ;;  %p3654_p0 = scmp.ge.s32.totalorder %s3991_s15, 1  ;;  %s3991_s15 = sphi %s4032_s15, %s14_s15  }
   0x2   : > { %p162_p1 = scmp.lt.s32.totalorder %s3991_s15, 3 }
   0x4   : > { %p163_p2 = pnand %p3654_p0, %p162_p1 }
   0x5   : > { %p188_p3 = scmp.lt.s32.totalorder (!%p163_p2), %s3650_s16, 1  ;;  %v3993_v0 = vmov (!%p163_p2), 0.0   ;;  %vm3994_vm0 = vmmov (!%p163_p2), 0   ;;  %s3995_s21 = smov (!%p163_p2), 127   ;;  %vm221_vm1 = vcmask (!%p163_p2), 1043456   ;;  %vm214_vm2 = vcmask (!%p163_p2), 1039360  }
   0x6   : > { %166 = sbr.rel (%p163_p2) target bundleno = 3315 (0xcf3), region = 36  ;;  %3801 = vmatprep.subr.mxu1 (!%p163_p2), %v3993_v0  ;;  %3803 = vmatprep.mubr.msk.f32.mxu1 (!%p163_p2), %vm3994_vm0, %v3993_v0  ;;  %s3996_s22 = smov (!%p163_p2), 126   ;;  %v3657_v14 = vld [vmem:[%s4466_s1 + $0x4] sm:$0xf] (!%p163_p2)  ;;  %vm217_vm3 = vcmask (!%p163_p2), 31744   ;;  %vm532_vm4 = vcmask (!%p163_p2), 1031168   ;;  %v1703_v60 = vlaneseq (!%p163_p2) }
   0x7   : > { %292 = vmatprep.mubr.f32.mxu0 (!%p163_p2), %v3993_v0  ;;  %s3997_s23 = smov (!%p163_p2), 110   ;;  %s3998_s24 = smov (!%p163_p2), 109   ;;  %v200_v21 = vld [vmem:[%s4466_s1] sm:$0xf] (!%p163_p2)  ;;  %vm701_vm5 = vcmask (!%p163_p2), 900096   ;;  %vm870_vm6 = vcmask (!%p163_p2), 891904  }
   0x8   : > { %s3999_s25 = smov (!%p163_p2), 108   ;;  %s4000_s26 = smov (!%p163_p2), 92   ;;  %v3668_v28 = vld [vmem:[%s4466_s1 + $0x8] sm:$0xf] (!%p163_p2)  ;;  %v3674_v34 = vld [vmem:[%s4466_s1 + $0xc] sm:$0xf] (!%p163_p2) }
   0x9   : > { %s4001_s27 = smov (!%p163_p2), 91   ;;  %s4002_s28 = smov (!%p163_p2), 90   ;;  %vm1039_vm7 = vcmask (!%p163_p2), 883712   ;;  %v3680_v40 = vld [vmem:[%s4466_s1 + $0x10] sm:$0xf] (!%p163_p2)  ;;  %vm1208_vm8 = vcmask (!%p163_p2), 752640  }
   0xa   : > { %v3686_v46 = vld [vmem:[%s4466_s1 + $0x14] sm:$0xf] (!%p163_p2)  ;;  %vm1377_vm9 = vcmask (!%p163_p2), 744448   ;;  %v3692_v51 = vld [vmem:[%s4466_s1 + $0x18] sm:$0xf] (!%p163_p2)  ;;  %vm4474_vm10 = vcmask (!%p163_p2), 736256  }
   0xb   : > { %v3698_v57 = vld [vmem:[%s4466_s1 + $0x1c] sm:$0xf] (!%p163_p2)  ;;  %v3704_v59 = vld [vmem:[%s4466_s1 + $0x20] sm:$0xf] (!%p163_p2)  ;;  %v1704_v62 = vshrl.u32 (!%p163_p2), %v1703_v60, 7  ;;  %vm4471_vm15 = vcmask (!%p163_p2), 551936  }
   0xc   : > { %v198_v61 = vld [vmem:[%s4468_s3] sm:$0x7] (!%p163_p2)  ;;  %s4004_s9 = smov (!%p163_p2), 19   ;;  %s4005_s10 = smov (!%p163_p2), 2  }
   0xd   : > { %s4487_s16 = smov (!%p188_p3, %s3650_s16), 1  ;;  %vm199_vm11 = vcmp.gt.f32.partialorder %v198_v61, 0.5  ;;  %v1705_v63 = vsub.s32 0, %v1704_v62  ;;  %s4006_s11 = smov 36  }
   0xe   : > { %s3955_s17 = smul.u32 12, %s4487_s16 }
  0x10   : > { %s4052_s20 = scalar_lea.vmem %s4465_s0, %s3955_s17 }
  0x11   : > { %v201_v1 = vld [vmem:[%s4052_s20] sm:$0xff]  ;;  %v202_v3 = vld [vmem:[%s4052_s20 + $0x8] sm:$0xf] }
  0x12   : > { %208 = vrot.lane.b32.xlu1 %v201_v1, %s3995_s21  ;;  %v207_v2 = vcombine.high %v201_v1, %v201_v1  ;;  %v522_v4 = vld [vmem:[%s4052_s20 + $0x8] sm:$0xf] }
  0x13   : > { %v691_v5 = vld [vmem:[%s4052_s20 + $0x8] sm:$0xf] }
  0x14   : > { %210 = vrot.lane.b32.xlu0 %v207_v2, %s3995_s21  ;;  %v860_v6 = vld [vmem:[%s4052_s20 + $0x8] sm:$0xf] }
  0x15   : > { %v1029_v7 = vld [vmem:[%s4052_s20 + $0x8] sm:$0xf] }
  0x16   : > { %528 = vrot.lane.b32.xlu1 %v207_v2, %s3996_s22  ;;  %v1198_v8 = vld [vmem:[%s4052_s20 + $0x8] sm:$0xf] }
  0x17   : > { %v1367_v9 = vld [vmem:[%s4052_s20 + $0x8] sm:$0xf] }
  0x18   : > { %212 = vrot.lane.b32.xlu0 %v202_v3, %s3995_s21  ;;  %v1536_v10 = vld [vmem:[%s4052_s20 + $0x8] sm:$0xf] }
  0x1a   : > { %526 = vrot.lane.b32.xlu1 %v201_v1, %s3996_s22 }
  0x1c   : > { %530 = vrot.lane.b32.xlu0 %v522_v4, %s3996_s22 }
  0x1e   : > { %699 = vrot.lane.b32.xlu1 %v691_v5, %s3997_s23 }
  0x20   : > { %697 = vrot.lane.b32.xlu0 %v207_v2, %s3997_s23 }
  0x22   : > { %866 = vrot.lane.b32.xlu1 %v207_v2, %s3998_s24 }
  0x24   : > { %695 = vrot.lane.b32.xlu0 %v201_v1, %s3997_s23 }
  0x26   : > { %864 = vrot.lane.b32.xlu1 %v201_v1, %s3998_s24 }
  0x28   : > { %868 = vrot.lane.b32.xlu0 %v860_v6, %s3998_s24 }
  0x2a   : > { %1037 = vrot.lane.b32.xlu1 %v1029_v7, %s3999_s25 }
  0x2c   : > { %1035 = vrot.lane.b32.xlu0 %v207_v2, %s3999_s25 }
  0x2e   : > { %1204 = vrot.lane.b32.xlu1 %v207_v2, %s4000_s26 }
  0x30   : > { %1033 = vrot.lane.b32.xlu0 %v201_v1, %s3999_s25 }
  0x32   : > { %1202 = vrot.lane.b32.xlu1 %v201_v1, %s4000_s26 }
  0x34   : > { %1206 = vrot.lane.b32.xlu0 %v1198_v8, %s4000_s26 }
  0x36   : > { %1375 = vrot.lane.b32.xlu1 %v1367_v9, %s4001_s27 }
  0x38   : > { %1373 = vrot.lane.b32.xlu0 %v207_v2, %s4001_s27 }
  0x3a   : > { %1542 = vrot.lane.b32.xlu1 %v207_v2, %s4002_s28 }
  0x3c   : > { %1371 = vrot.lane.b32.xlu0 %v201_v1, %s4001_s27 }
  0x3e   : > { %1540 = vrot.lane.b32.xlu1 %v201_v1, %s4002_s28 }
  0x40   : > { %1544 = vrot.lane.b32.xlu0 %v1536_v10, %s4002_s28 }
  0x84   : > { %v209_v11 = vpop.permute.xlu1 %208 }
  0x86   : > { %v211_v12 = vpop.permute.xlu0 %210 }
  0x87   : > { %v215_v17 = vsel %vm214_vm2, %v209_v11, %v211_v12 }
  0x88   : > { %v529_v13 = vpop.permute.xlu1 %528 }
  0x8a   : > { %v213_v15 = vpop.permute.xlu0 %212 }
  0x8b   : > { %3802 = vmatpush3.msk.msra.mxu1 %vm221_vm1, %v213_v15  ;;  %v216_v16 = vsel %vm214_vm2, %v211_v12, %v213_v15 }
  0x8c   : > { %3658 = vmatprep.subr.msk.mxu0 %vm221_vm1, %v216_v16  ;;  %3804 = vmatmul.mubr.msk.f32.vlgmr.msra.gmra.mrb[0].mxu1 %vm217_vm3, %v3657_v14  ;;  %v527_v18 = vpop.permute.xlu1 %526 }
  0x8d   : > { %3659 = vmatpush1.msk.msra.mxu0 %vm221_vm1, %v215_v17  ;;  %3806 = vmatprep.subr.mxu1 %v3993_v0  ;;  %v533_v24 = vsel %vm532_vm4, %v527_v18, %v529_v13 }
  0x8e   : > { %3660 = vmatmul.mubr.msk.f32.vlgmr.msra.gmra.mrb[0].mxu0 %vm217_vm3, %v3657_v14  ;;  %3663 = vmatprep.subr.msk.mxu0 %vm221_vm1, %v207_v2  ;;  %v531_v19 = vpop.permute.xlu0 %530  ;;  %v1709_v2 = vsub.s32 1, %v1704_v62 }
  0x8f   : > { %3664 = vmatpush1.msk.msra.mxu0 %vm221_vm1, %v201_v1  ;;  %3807 = vmatpush3.msk.msra.mxu1 %vm221_vm1, %v202_v3  ;;  %v534_v20 = vsel %vm532_vm4, %v529_v13, %v531_v19  ;;  %v1713_v1 = vsub.s32 2, %v1704_v62  ;;  %v4003_v3 = vmov 0  }
  0x90   : > { %3808 = vmatprep.mubr.msk.f32.mxu1 %vm3994_vm0, %v3993_v0  ;;  %442 = vmatprep.mubr.f32.mxu0 %v3993_v0  ;;  %v700_v23 = vpop.permute.xlu1 %699  ;;  %v1702_v4 = vsel %vm199_vm11, 1, %v4003_v3  ;;  %vm1755_vm11 = vcmask 150528  }
  0x91   : > { %3669 = vmatprep.subr.msk.mxu0 %vm221_vm1, %v534_v20  ;;  %3811 = vmatprep.subr.mxu1 %v3993_v0  ;;  %v4214_v5 = vrot.slane %v1702_v4, %v1705_v63  ;;  %v4216_v6 = vrot.slane %v1702_v4, %v1713_v1  ;;  %v4218_v7 = vrot.slane %v1702_v4, %v1709_v2 }
  0x92   : > { %v698_v22 = vpop.permute.xlu0 %697  ;;  %1756 = vst.msk [vmem:[#allocation2] sm:$0xf] %vm1755_vm11, %v3993_v0  ;;  %vm1889_vm11 = vcmask 134272  }
  0x93   : > { %v703_v25 = vsel %vm701_vm5, %v698_v22, %v700_v23  ;;  %vm4473_vm12 = vcmp.eq.s32.totalorder %v4214_v5, 1  ;;  %vm4472_vm13 = vcmp.eq.s32.totalorder %v4216_v6, 1  ;;  %vm4470_vm14 = vcmp.eq.s32.totalorder %v4218_v7, 1 }
  0x94   : > { %3809 = vmatmul.mubr.msk.f32.vlgmr.msra.gmra.mrb[0].mxu1 %vm217_vm3, %v200_v21  ;;  %v867_v27 = vpop.permute.xlu1 %866 }
  0x95   : > { %3812 = vmatpush3.msk.msra.mxu1 %vm221_vm1, %v531_v19  ;;  %3813 = vmatprep.mubr.msk.f32.mxu1 %vm3994_vm0, %v3993_v0 }
  0x96   : > { %3665 = vmatmul.mubr.msk.f32.vlgmr.msra.gmra.mrb[0].mxu0 %vm217_vm3, %v200_v21  ;;  %v696_v26 = vpop.permute.xlu0 %695  ;;  %3816 = vmatprep.subr.mxu1 %v3993_v0 }
  0x97   : > { %3670 = vmatpush1.msk.msra.mxu0 %vm221_vm1, %v533_v24  ;;  %608 = vmatprep.mubr.f32.mxu0 %v3993_v0  ;;  %v702_v30 = vsel %vm701_vm5, %v696_v26, %v698_v22 }
  0x98   : > { %3675 = vmatprep.subr.msk.mxu0 %vm221_vm1, %v703_v25  ;;  %v865_v32 = vpop.permute.xlu1 %864 }
  0x99   : > { %v871_v36 = vsel %vm870_vm6, %v865_v32, %v867_v27 }
  0x9a   : > { %v869_v29 = vpop.permute.xlu0 %868 }
  0x9b   : > { %v872_v31 = vsel %vm870_vm6, %v867_v27, %v869_v29 }
  0x9c   : > { %3814 = vmatmul.mubr.msk.f32.vlgmr.msra.gmra.mrb[0].mxu1 %vm217_vm3, %v3668_v28  ;;  %v1038_v35 = vpop.permute.xlu1 %1037 }
  0x9d   : > { %3817 = vmatpush3.msk.msra.mxu1 %vm221_vm1, %v700_v23  ;;  %3818 = vmatprep.mubr.msk.f32.mxu1 %vm3994_vm0, %v3993_v0 }
  0x9e   : > { %3671 = vmatmul.mubr.msk.f32.vlgmr.msra.gmra.mrb[0].mxu0 %vm217_vm3, %v3668_v28  ;;  %3821 = vmatprep.subr.mxu1 %v3993_v0  ;;  %v1036_v33 = vpop.permute.xlu0 %1035 }
  0x9f   : > { %3676 = vmatpush1.msk.msra.mxu0 %vm221_vm1, %v702_v30  ;;  %777 = vmatprep.mubr.f32.mxu0 %v3993_v0  ;;  %v1041_v37 = vsel %vm1039_vm7, %v1036_v33, %v1038_v35 }
  0xa0   : > { %3681 = vmatprep.subr.msk.mxu0 %vm221_vm1, %v872_v31  ;;  %v1205_v39 = vpop.permute.xlu1 %1204 }
  0xa2   : > { %v1034_v38 = vpop.permute.xlu0 %1033 }
  0xa3   : > { %v1040_v42 = vsel %vm1039_vm7, %v1034_v38, %v1036_v33 }
  0xa4   : > { %3819 = vmatmul.mubr.msk.f32.vlgmr.msra.gmra.mrb[0].mxu1 %vm217_vm3, %v3674_v34  ;;  %v1203_v44 = vpop.permute.xlu1 %1202 }
  0xa5   : > { %3822 = vmatpush3.msk.msra.mxu1 %vm221_vm1, %v869_v29  ;;  %3823 = vmatprep.mubr.msk.f32.mxu1 %vm3994_vm0, %v3993_v0  ;;  %v1209_v48 = vsel %vm1208_vm8, %v1203_v44, %v1205_v39 }
  0xa6   : > { %3677 = vmatmul.mubr.msk.f32.vlgmr.msra.gmra.mrb[0].mxu0 %vm217_vm3, %v3674_v34  ;;  %3826 = vmatprep.subr.mxu1 %v3993_v0  ;;  %v1207_v41 = vpop.permute.xlu0 %1206 }
  0xa7   : > { %3682 = vmatpush1.msk.msra.mxu0 %vm221_vm1, %v871_v36  ;;  %946 = vmatprep.mubr.f32.mxu0 %v3993_v0  ;;  %v1210_v43 = vsel %vm1208_vm8, %v1205_v39, %v1207_v41 }
  0xa8   : > { %3687 = vmatprep.subr.msk.mxu0 %vm221_vm1, %v1041_v37  ;;  %v1376_v47 = vpop.permute.xlu1 %1375 }
  0xaa   : > { %v1374_v45 = vpop.permute.xlu0 %1373 }
  0xab   : > { %v1379_v49 = vsel %vm1377_vm9, %v1374_v45, %v1376_v47 }
  0xac   : > { %3824 = vmatmul.mubr.msk.f32.vlgmr.msra.gmra.mrb[0].mxu1 %vm217_vm3, %v3680_v40  ;;  %v1543_v53 = vpop.permute.xlu1 %1542 }
  0xad   : > { %3827 = vmatpush3.msk.msra.mxu1 %vm221_vm1, %v1038_v35  ;;  %3828 = vmatprep.mubr.msk.f32.mxu1 %vm3994_vm0, %v3993_v0 }
  0xae   : > { %3683 = vmatmul.mubr.msk.f32.vlgmr.msra.gmra.mrb[0].mxu0 %vm217_vm3, %v3680_v40  ;;  %3831 = vmatprep.subr.mxu1 %v3993_v0  ;;  %v1372_v50 = vpop.permute.xlu0 %1371 }
  0xaf   : > { %3688 = vmatpush1.msk.msra.mxu0 %vm221_vm1, %v1040_v42  ;;  %1115 = vmatprep.mubr.f32.mxu0 %v3993_v0  ;;  %v1378_v54 = vsel %vm1377_vm9, %v1372_v50, %v1374_v45 }
  0xb0   : > { %3693 = vmatprep.subr.msk.mxu0 %vm221_vm1, %v1210_v43  ;;  %v1541_v56 = vpop.permute.xlu1 %1540 }
  0xb1   : > { %v1547_v58 = vsel %vm4474_vm10, %v1541_v56, %v1543_v53 }
  0xb2   : > { %v1545_v52 = vpop.permute.xlu0 %1544 }
  0xb3   : > { %v1548_v55 = vsel %vm4474_vm10, %v1543_v53, %v1545_v52  ;;  %vm1784_vm10 = vcmask 298136  }
  0xb4   : > { %3829 = vmatmul.mubr.msk.f32.vlgmr.msra.gmra.mrb[0].mxu1 %vm217_vm3, %v3686_v46 }
  0xb5   : > { %3832 = vmatpush3.msk.msra.mxu1 %vm221_vm1, %v1207_v41  ;;  %3833 = vmatprep.mubr.msk.f32.mxu1 %vm3994_vm0, %v3993_v0 }
  0xb6   : > { %3689 = vmatmul.mubr.msk.f32.vlgmr.msra.gmra.mrb[0].mxu0 %vm217_vm3, %v3686_v46  ;;  %3836 = vmatprep.subr.mxu1 %v3993_v0 }
  0xb7   : > { %3694 = vmatpush1.msk.msra.mxu0 %vm221_vm1, %v1209_v48  ;;  %1284 = vmatprep.mubr.f32.mxu0 %v3993_v0 }
  0xb8   : > { %3699 = vmatprep.subr.msk.mxu0 %vm221_vm1, %v1379_v49 }
  0xbc   : > { %3834 = vmatmul.mubr.msk.f32.vlgmr.msra.gmra.mrb[0].mxu1 %vm217_vm3, %v3692_v51 }
  0xbd   : > { %3837 = vmatpush3.msk.msra.mxu1 %vm221_vm1, %v1376_v47  ;;  %3838 = vmatprep.mubr.msk.f32.mxu1 %vm3994_vm0, %v3993_v0 }
  0xbe   : > { %3695 = vmatmul.mubr.msk.f32.vlgmr.msra.gmra.mrb[0].mxu0 %vm217_vm3, %v3692_v51  ;;  %3841 = vmatprep.subr.mxu1 %v3993_v0 }
  0xbf   : > { %3700 = vmatpush1.msk.msra.mxu0 %vm221_vm1, %v1378_v54  ;;  %1453 = vmatprep.mubr.f32.mxu0 %v3993_v0 }
  0xc0   : > { %3705 = vmatprep.subr.msk.mxu0 %vm221_vm1, %v1548_v55 }
  0xc4   : > { %3839 = vmatmul.mubr.msk.f32.vlgmr.msra.gmra.mrb[0].mxu1 %vm217_vm3, %v3698_v57 }
  0xc5   : > { %3842 = vmatpush3.msk.msra.mxu1 %vm221_vm1, %v1545_v52  ;;  %3843 = vmatprep.mubr.msk.f32.mxu1 %vm3994_vm0, %v3993_v0 }
  0xc6   : > { %3701 = vmatmul.mubr.msk.f32.vlgmr.msra.gmra.mrb[0].mxu0 %vm217_vm3, %v3698_v57  ;;  %3846 = vmatprep.subr.mxu1 %v3993_v0 }
  0xc7   : > { %3706 = vmatpush1.msk.msra.mxu0 %vm221_vm1, %v1547_v58  ;;  %1622 = vmatprep.mubr.f32.mxu0 %v3993_v0 }
  0xcc   : > { %3844 = vmatmul.mubr.msk.f32.vlgmr.msra.gmra.mrb[0].mxu1 %vm217_vm3, %v3704_v59 }
  0xcd   : > { %3848 = vmatprep.mubr.msk.f32.mxu1 %vm3994_vm0, %v3993_v0 }
  0xce   : > { %3707 = vmatmul.mubr.msk.f32.vlgmr.msra.gmra.mrb[0].mxu0 %vm217_vm3, %v3704_v59 }
  0xcf   : > { %2134 = vmatprep.mubr.f32.mxu0 %v3993_v0 }
 0x19f   : > { %v1695_v8 = vpop.f32.mrb[0].mxu1 }
 0x1a0   : > { %v3845_v9 = vpop.f32.mrb[1].mxu1  ;;  %v1720_v13 = vsel %vm4472_vm13, %v1695_v8, 0.0 }
 0x1a1   : > { %v1624_v10 = vpop.f32.mrb[0].mxu0  ;;  %v1725_v18 = vsel %vm4471_vm15, %v1720_v13, 0.0 }
 0x1a2   : > { %v1718_v11 = vsel %vm4473_vm12, %v1624_v10, 0.0  ;;  %v1626_v12 = vpop.f32.mrb[1].mxu0 }
 0x1a3   : > { %v1721_v14 = vsel %vm221_vm1, %v1718_v11, 0.0  ;;  %v1719_v15 = vsel %vm4470_vm14, %v1626_v12, 0.0 }
 0x1a4   : > { %v1722_v16 = vsel %vm221_vm1, %v1719_v15, 0.0 }
 0x1a5   : > { %v1723_v17 = vadd.f32 %v1722_v16, %v1721_v14 }
 0x1a7   : > { %v1726_v19 = vadd.f32 %v1725_v18, %v1723_v17 }
 0x1a9   : > { %1727 = vadd.xlane.f32.xlu0 %v1726_v19 }
 0x236   : > { %v1728_v20 = vpop.xlane.xlu0 %1727 }
 0x237   : > { %v1729_v21 = vmul.f32 0.00390625, %v1728_v20 }
 0x239   : > { %v1730_v22 = vsub.f32 %v1624_v10, %v1729_v21  ;;  %v1731_v23 = vsub.f32 %v1626_v12, %v1729_v21  ;;  %v1732_v24 = vsub.f32 %v1695_v8, %v1729_v21 }
 0x23b   : > { %v1733_v25 = vmul.f32 %v1730_v22, %v1730_v22  ;;  %v1734_v26 = vmul.f32 %v1731_v23, %v1731_v23  ;;  %v1735_v27 = vmul.f32 %v1732_v24, %v1732_v24 }
 0x23d   : > { %v1736_v28 = vsel %vm4473_vm12, %v1733_v25, 0.0  ;;  %v1737_v29 = vsel %vm4470_vm14, %v1734_v26, 0.0  ;;  %v1738_v30 = vsel %vm4472_vm13, %v1735_v27, 0.0  ;;  %vm1773_vm14 = vcmask 1043608  }
 0x23e   : > { %v1739_v31 = vsel %vm221_vm1, %v1736_v28, 0.0  ;;  %v1740_v32 = vsel %vm221_vm1, %v1737_v29, 0.0  ;;  %v1742_v34 = vsel %vm4471_vm15, %v1738_v30, 0.0  ;;  %vm1774_vm15 = vcmask 1047556  }
 0x23f   : > { %v1741_v33 = vadd.f32 %v1740_v32, %v1739_v31  ;;  %vm1768_vm13 = vcmask 154624   ;;  %vm1775_vm12 = vmor %vm1774_vm15, %vm1773_vm14  ;;  %vm1896_vm14 = vcmask 142472   ;;  %vm1798_vm15 = vcmask 158872  }
 0x241   : > { %v1743_v35 = vadd.f32 %v1742_v34, %v1741_v33 }
 0x243   : > { %1744 = vadd.xlane.f32.xlu1 %v1743_v35 }
 0x2d0   : > { %v1745_v36 = vpop.xlane.xlu1 %1744 }
 0x2d1   : > { %v1746_v37 = vmul.f32 0.00390625, %v1745_v36 }
 0x2d3   : > { %v1747_v38 = vadd.f32 1e-05, %v1746_v37 }
 0x2d5   : > { %3981 = vrsqrt.f32 %v1747_v38 }
 0x2df   : > { %v3982_v39 = vpop.eup %3981 }
 0x2e0   : > { %v1749_v40 = vmul.f32 %v3982_v39, %v1730_v22  ;;  %v1750_v41 = vmul.f32 %v3982_v39, %v1731_v23  ;;  %v1751_v57 = vmul.f32 %v3982_v39, %v1732_v24 }
 0x2e2   : > { %v1752_v42 = vmax.f32 %v1749_v40, 0.0  ;;  %v1753_v43 = vmax.f32 %v1750_v41, 0.0  ;;  %v1754_v60 = vmax.f32 %v1751_v57, 0.0 }
 0x2e4   : > { %v1762_v44 = vcombine.low %v1752_v42, %v1753_v43 }
 0x2e6   : > { %1763 = vrot.lane.b32.xlu0 %v1762_v44, %s4004_s9 }
 0x358   : > { %v1764_v45 = vpop.permute.xlu0 %1763 }
 0x359   : > { %v1767_v46 = vrot.slane %v1764_v45, 4 }
 0x35b   : > { %v1769_v47 = vsel %vm1768_vm13, %v1767_v46, %v1764_v45 }
 0x35c   : > { %1776 = vst.msk [vmem:[#allocation2] sm:$0xff] %vm1775_vm12, %v1769_v47  ;;  %vm1757_vm12 = vcmask 863928  }
 0x35d   : > { %1758 = vst.msk [vmem:[#allocation2 + $0x8] sm:$0xf] %vm1757_vm12, %v3993_v0  ;;  %vm1777_vm12 = vcmask 707584  }
 0x363   : > { %v1779_v48 = vld [vmem:[#allocation2] sm:$0xf]  ;;  %v1884_v49 = vld [vmem:[#allocation2 + $0x4] sm:$0xf] }
 0x364   : > { %1886 = vrot.lane.b32.xlu1 %v1884_v49, %s4005_s10  ;;  %1781 = vrot.lane.b32.xlu0 %v1779_v48, %s4000_s26  ;;  %v4246_v50 = vld [vmem:[#allocation2 + $0x4] sm:$0xf] }
 0x3d6   : > { %v1887_v51 = vpop.permute.xlu1 %1886  ;;  %v1782_v52 = vpop.permute.xlu0 %1781 }
 0x3d7   : > { %1890 = vst.msk [vmem:[#allocation2 + $0x4] sm:$0xf] %vm1889_vm11, %v1887_v51  ;;  %vm1805_vm11 = vcmask 298272  }
 0x3d8   : > { %1785 = vst.msk [vmem:[#allocation2] sm:$0xf] %vm1784_vm10, %v1782_v52  ;;  %vm1903_vm10 = vcmask 281872  }
 0x3de   : > { %v1891_v53 = vld [vmem:[#allocation2 + $0x4] sm:$0xf] }
 0x3df   : > { %v1793_v54 = vld [vmem:[#allocation2] sm:$0xf]  ;;  %1893 = vrot.lane.b32.xlu1 %v1891_v53, %s3996_s22 }
 0x3e0   : > { %1795 = vrot.lane.b32.xlu0 %v1793_v54, %s3996_s22 }
 0x451   : > { %v1894_v55 = vpop.permute.xlu1 %1893 }
 0x452   : > { %v1796_v56 = vpop.permute.xlu0 %1795  ;;  %1897 = vst.msk [vmem:[#allocation2 + $0x4] sm:$0xf] %vm1896_vm14, %v1894_v55  ;;  %vm1910_vm14 = vcmask 290072  }
 0x453   : > { %1799 = vst.msk [vmem:[#allocation2] sm:$0xf] %vm1798_vm15, %v1796_v56  ;;  %vm1812_vm15 = vcmask 306472  }
 0x459   : > { %v1898_v58 = vld [vmem:[#allocation2 + $0x4] sm:$0xf] }
 0x45a   : > { %v1800_v59 = vld [vmem:[#allocation2] sm:$0xf]  ;;  %1900 = vrot.lane.b32.xlu1 %v1898_v58, %s4005_s10 }
 0x45b   : > { %1802 = vrot.lane.b32.xlu0 %v1800_v59, %s4005_s10 }
 0x45f   : > { %1765 = vrot.lane.b32.xlu0 %v1754_v60, %s4004_s9 }
 0x4cc   : > { %v1901_v61 = vpop.permute.xlu1 %1900 }
 0x4cd   : > { %v1803_v62 = vpop.permute.xlu0 %1802  ;;  %1904 = vst.msk [vmem:[#allocation2 + $0x4] sm:$0xf] %vm1903_vm10, %v1901_v61  ;;  %vm1791_vm10 = vcmask 708136  }
 0x4ce   : > { %1806 = vst.msk [vmem:[#allocation2] sm:$0xf] %vm1805_vm11, %v1803_v62  ;;  %vm1819_vm11 = vcmask 445872  }
 0x4d1   : > { %v1766_v63 = vpop.permute.xlu0 %1765 }
 0x4d2   : > { %v1770_v1 = vsel %vm1768_vm13, %v1767_v46, %v1766_v63  ;;  %vm1917_vm13 = vcmask 429472  }
 0x4d3   : > { %1778 = vst.msk [vmem:[#allocation2 + $0x8] sm:$0xf] %vm1777_vm12, %v1770_v1  ;;  %vm1987_vm12 = vcmask 117872  }
 0x4d4   : > { %v1905_v2 = vld [vmem:[#allocation2 + $0x4] sm:$0xf] }
 0x4d5   : > { %1907 = vrot.lane.b32.xlu1 %v1905_v2, %s3996_s22  ;;  %v1807_v3 = vld [vmem:[#allocation2] sm:$0xf] }
 0x4d9   : > { %1809 = vrot.lane.b32.xlu1 %v1807_v3, %s3996_s22 }
 0x4da   : > { %v1786_v4 = vld [vmem:[#allocation2 + $0x8] sm:$0xf] }
 0x4dd   : > { %1788 = vrot.lane.b32.xlu1 %v1786_v4, %s4006_s11 }
 0x547   : > { %v1908_v8 = vpop.permute.xlu1 %1907 }
 0x548   : > { %1911 = vst.msk [vmem:[#allocation2 + $0x4] sm:$0xf] %vm1910_vm14, %v1908_v8  ;;  %vm1924_vm14 = vcmask 437672  }
 0x54b   : > { %v1810_v9 = vpop.permute.xlu1 %1809 }
 0x54c   : > { %1813 = vst.msk [vmem:[#allocation2] sm:$0xf] %vm1812_vm15, %v1810_v9  ;;  %vm1826_vm15 = vcmask 454072   ;;  %v3710_v9 = vld [vmem:[%s4467_s2 + $0x4] sm:$0xf] }
 0x54f   : > { %v1789_v10 = vpop.permute.xlu1 %1788  ;;  %v1912_v11 = vld [vmem:[#allocation2 + $0x4] sm:$0xf] }
 0x550   : > { %1792 = vst.msk [vmem:[#allocation2 + $0x8] sm:$0xf] %vm1791_vm10, %v1789_v10  ;;  %1914 = vrot.lane.b32.xlu0 %v1912_v11, %s4005_s10  ;;  %vm1994_vm10 = vcmask 126072  }
 0x553   : > { %v1814_v12 = vld [vmem:[#allocation2] sm:$0xf] }
 0x554   : > { %1816 = vrot.lane.b32.xlu0 %v1814_v12, %s4005_s10 }
 0x557   : > { %v1982_v13 = vld [vmem:[#allocation2 + $0x8] sm:$0xf] }
 0x558   : > { %1984 = vrot.lane.b32.xlu0 %v1982_v13, %s4005_s10  ;;  %v2045_v13 = vld [vmem:[%s4467_s2] sm:$0xf] }
 0x5c2   : > { %v1915_v14 = vpop.permute.xlu0 %1914 }
 0x5c3   : > { %1918 = vst.msk [vmem:[#allocation2 + $0x4] sm:$0xf] %vm1917_vm13, %v1915_v14  ;;  %vm1931_vm13 = vcmask 577072  }
 0x5c6   : > { %v1817_v15 = vpop.permute.xlu0 %1816 }
 0x5c7   : > { %1820 = vst.msk [vmem:[#allocation2] sm:$0xf] %vm1819_vm11, %v1817_v15  ;;  %vm1833_vm11 = vcmask 593472  }
 0x5ca   : > { %v1985_v16 = vpop.permute.xlu0 %1984  ;;  %v1919_v17 = vld [vmem:[#allocation2 + $0x4] sm:$0xf] }
 0x5cb   : > { %1988 = vst.msk [vmem:[#allocation2 + $0x8] sm:$0xf] %vm1987_vm12, %v1985_v16  ;;  %1921 = vrot.lane.b32.xlu1 %v1919_v17, %s3996_s22  ;;  %vm2001_vm12 = vcmask 265472  }
 0x5ce   : > { %v1821_v18 = vld [vmem:[#allocation2] sm:$0xf] }
 0x5cf   : > { %1823 = vrot.lane.b32.xlu1 %v1821_v18, %s3996_s22 }
 0x5d2   : > { %v1989_v19 = vld [vmem:[#allocation2 + $0x8] sm:$0xf] }
 0x5d3   : > { %1991 = vrot.lane.b32.xlu1 %v1989_v19, %s3996_s22 }
 0x63d   : > { %v1922_v20 = vpop.permute.xlu1 %1921 }
 0x63e   : > { %1925 = vst.msk [vmem:[#allocation2 + $0x4] sm:$0xf] %vm1924_vm14, %v1922_v20  ;;  %vm1938_vm14 = vcmask 585272  }
 0x641   : > { %v1824_v21 = vpop.permute.xlu1 %1823 }
 0x642   : > { %1827 = vst.msk [vmem:[#allocation2] sm:$0xf] %vm1826_vm15, %v1824_v21  ;;  %vm1840_vm15 = vcmask 601672  }
 0x645   : > { %v1992_v22 = vpop.permute.xlu1 %1991  ;;  %v1926_v23 = vld [vmem:[#allocation2 + $0x4] sm:$0xf] }
 0x646   : > { %1995 = vst.msk [vmem:[#allocation2 + $0x8] sm:$0xf] %vm1994_vm10, %v1992_v22  ;;  %1928 = vrot.lane.b32.xlu0 %v1926_v23, %s4005_s10  ;;  %vm2008_vm10 = vcmask 273672  }
 0x649   : > { %v1828_v24 = vld [vmem:[#allocation2] sm:$0xf] }
 0x64a   : > { %1830 = vrot.lane.b32.xlu0 %v1828_v24, %s4005_s10 }
 0x64d   : > { %v1996_v25 = vld [vmem:[#allocation2 + $0x8] sm:$0xf] }
 0x64e   : > { %1998 = vrot.lane.b32.xlu0 %v1996_v25, %s4005_s10 }
 0x6b8   : > { %v1929_v26 = vpop.permute.xlu0 %1928 }
 0x6b9   : > { %1932 = vst.msk [vmem:[#allocation2 + $0x4] sm:$0xf] %vm1931_vm13, %v1929_v26  ;;  %vm1945_vm13 = vcmask 724672  }
 0x6bc   : > { %v1831_v27 = vpop.permute.xlu0 %1830 }
 0x6bd   : > { %1834 = vst.msk [vmem:[#allocation2] sm:$0xf] %vm1833_vm11, %v1831_v27  ;;  %vm1847_vm11 = vcmask 741072  }
 0x6c0   : > { %v1999_v28 = vpop.permute.xlu0 %1998  ;;  %v1933_v29 = vld [vmem:[#allocation2 + $0x4] sm:$0xf] }
 0x6c1   : > { %2002 = vst.msk [vmem:[#allocation2 + $0x8] sm:$0xf] %vm2001_vm12, %v1999_v28  ;;  %1935 = vrot.lane.b32.xlu1 %v1933_v29, %s3996_s22  ;;  %vm2015_vm12 = vcmask 413072   ;;  %v3721_v28 = vld [vmem:[%s4467_s2 + $0x8] sm:$0xf] }
 0x6c4   : > { %v1835_v30 = vld [vmem:[#allocation2] sm:$0xf] }
 0x6c5   : > { %1837 = vrot.lane.b32.xlu1 %v1835_v30, %s3996_s22 }
 0x6c8   : > { %v2003_v31 = vld [vmem:[#allocation2 + $0x8] sm:$0xf] }
 0x6c9   : > { %2005 = vrot.lane.b32.xlu1 %v2003_v31, %s3996_s22 }
 0x733   : > { %v1936_v32 = vpop.permute.xlu1 %1935 }
 0x734   : > { %1939 = vst.msk [vmem:[#allocation2 + $0x4] sm:$0xf] %vm1938_vm14, %v1936_v32  ;;  %vm1952_vm14 = vcmask 732872  }
 0x737   : > { %v1838_v33 = vpop.permute.xlu1 %1837 }
 0x738   : > { %1841 = vst.msk [vmem:[#allocation2] sm:$0xf] %vm1840_vm15, %v1838_v33  ;;  %vm1854_vm15 = vcmask 749272  }
 0x73b   : > { %v2006_v34 = vpop.permute.xlu1 %2005  ;;  %v1940_v35 = vld [vmem:[#allocation2 + $0x4] sm:$0xf] }
 0x73c   : > { %2009 = vst.msk [vmem:[#allocation2 + $0x8] sm:$0xf] %vm2008_vm10, %v2006_v34  ;;  %1942 = vrot.lane.b32.xlu0 %v1940_v35, %s4005_s10  ;;  %vm2022_vm10 = vcmask 421272   ;;  %v3727_v34 = vld [vmem:[%s4467_s2 + $0xc] sm:$0xf] }
 0x73f   : > { %v1842_v36 = vld [vmem:[#allocation2] sm:$0xf] }
 0x740   : > { %1844 = vrot.lane.b32.xlu0 %v1842_v36, %s4005_s10 }
 0x743   : > { %v2010_v37 = vld [vmem:[#allocation2 + $0x8] sm:$0xf] }
 0x744   : > { %2012 = vrot.lane.b32.xlu0 %v2010_v37, %s4005_s10 }
 0x7ae   : > { %v1943_v38 = vpop.permute.xlu0 %1942 }
 0x7af   : > { %1946 = vst.msk [vmem:[#allocation2 + $0x4] sm:$0xf] %vm1945_vm13, %v1943_v38  ;;  %vm1959_vm13 = vcmask 872272  }
 0x7b2   : > { %v1845_v39 = vpop.permute.xlu0 %1844 }
 0x7b3   : > { %1848 = vst.msk [vmem:[#allocation2] sm:$0xf] %vm1847_vm11, %v1845_v39  ;;  %vm1861_vm11 = vcmask 888672  }
 0x7b6   : > { %v2013_v40 = vpop.permute.xlu0 %2012  ;;  %v1947_v41 = vld [vmem:[#allocation2 + $0x4] sm:$0xf] }
 0x7b7   : > { %2016 = vst.msk [vmem:[#allocation2 + $0x8] sm:$0xf] %vm2015_vm12, %v2013_v40  ;;  %1949 = vrot.lane.b32.xlu1 %v1947_v41, %s3996_s22  ;;  %vm2029_vm12 = vcmask 560672   ;;  %v3733_v40 = vld [vmem:[%s4467_s2 + $0x10] sm:$0xf] }
 0x7ba   : > { %v1849_v42 = vld [vmem:[#allocation2] sm:$0xf] }
 0x7bb   : > { %1851 = vrot.lane.b32.xlu1 %v1849_v42, %s3996_s22 }
 0x7be   : > { %v2017_v43 = vld [vmem:[#allocation2 + $0x8] sm:$0xf] }
 0x7bf   : > { %2019 = vrot.lane.b32.xlu1 %v2017_v43, %s3996_s22 }
 0x829   : > { %v1950_v44 = vpop.permute.xlu1 %1949 }
 0x82a   : > { %1953 = vst.msk [vmem:[#allocation2 + $0x4] sm:$0xf] %vm1952_vm14, %v1950_v44  ;;  %vm1966_vm14 = vcmask 880472  }
 0x82d   : > { %v1852_v45 = vpop.permute.xlu1 %1851 }
 0x82e   : > { %1855 = vst.msk [vmem:[#allocation2] sm:$0xf] %vm1854_vm15, %v1852_v45  ;;  %vm1868_vm15 = vcmask 896872  }
 0x831   : > { %v2020_v46 = vpop.permute.xlu1 %2019  ;;  %v1954_v47 = vld [vmem:[#allocation2 + $0x4] sm:$0xf] }
 0x832   : > { %2023 = vst.msk [vmem:[#allocation2 + $0x8] sm:$0xf] %vm2022_vm10, %v2020_v46  ;;  %1956 = vrot.lane.b32.xlu0 %v1954_v47, %s4005_s10  ;;  %vm2036_vm10 = vcmask 568872   ;;  %v3739_v47 = vld [vmem:[%s4467_s2 + $0x14] sm:$0xf] }
 0x835   : > { %v1856_v48 = vld [vmem:[#allocation2] sm:$0xf] }
 0x836   : > { %1858 = vrot.lane.b32.xlu0 %v1856_v48, %s4005_s10 }
 0x839   : > { %v2024_v49 = vld [vmem:[#allocation2 + $0x8] sm:$0xf] }
 0x83a   : > { %2026 = vrot.lane.b32.xlu0 %v2024_v49, %s4005_s10 }
 0x8a4   : > { %v1957_v51 = vpop.permute.xlu0 %1956 }
 0x8a5   : > { %1960 = vst.msk [vmem:[#allocation2 + $0x4] sm:$0xf] %vm1959_vm13, %v1957_v51  ;;  %vm1973_vm13 = vcmask 1019872  }
 0x8a8   : > { %v1859_v52 = vpop.permute.xlu0 %1858 }
 0x8a9   : > { %1862 = vst.msk [vmem:[#allocation2] sm:$0xf] %vm1861_vm11, %v1859_v52  ;;  %vm1875_vm11 = vcmask 1036272  }
 0x8ac   : > { %v2027_v53 = vpop.permute.xlu0 %2026  ;;  %v1961_v54 = vld [vmem:[#allocation2 + $0x4] sm:$0xf] }
 0x8ad   : > { %2030 = vst.msk [vmem:[#allocation2 + $0x8] sm:$0xf] %vm2029_vm12, %v2027_v53  ;;  %1963 = vrot.lane.b32.xlu1 %v1961_v54, %s3996_s22  ;;  %vm1882_vm12 = vcmask 1044472   ;;  %v3745_v54 = vld [vmem:[%s4467_s2 + $0x18] sm:$0xf] }
 0x8b0   : > { %v1863_v55 = vld [vmem:[#allocation2] sm:$0xf] }
 0x8b1   : > { %1865 = vrot.lane.b32.xlu1 %v1863_v55, %s3996_s22 }
 0x8b4   : > { %v2031_v56 = vld [vmem:[#allocation2 + $0x8] sm:$0xf] }
 0x8b5   : > { %2033 = vrot.lane.b32.xlu1 %v2031_v56, %s3996_s22 }
 0x8b9   : > { %1879 = vrot.lane.b32.xlu1 %v4246_v50, %s3996_s22 }
 0x91f   : > { %v1964_v57 = vpop.permute.xlu1 %1963 }
 0x920   : > { %1967 = vst.msk [vmem:[#allocation2 + $0x4] sm:$0xf] %vm1966_vm14, %v1964_v57  ;;  %vm2043_vm14 = vcmask 708272  }
 0x923   : > { %v1866_v58 = vpop.permute.xlu1 %1865 }
 0x924   : > { %1869 = vst.msk [vmem:[#allocation2] sm:$0xf] %vm1868_vm15, %v1866_v58  ;;  %vm1980_vm15 = vcmask 1028072  }
 0x927   : > { %v2034_v59 = vpop.permute.xlu1 %2033  ;;  %v1968_v60 = vld [vmem:[#allocation2 + $0x4] sm:$0xf] }
 0x928   : > { %1970 = vrot.lane.b32.xlu0 %v1968_v60, %s4005_s10  ;;  %2037 = vst.msk [vmem:[#allocation2 + $0x8] sm:$0xf] %vm2036_vm10, %v2034_v59  ;;  %v3751_v59 = vld [vmem:[%s4467_s2 + $0x1c] sm:$0xf] }
 0x92b   : > { %v1870_v61 = vld [vmem:[#allocation2] sm:$0xf]  ;;  %v1880_v63 = vpop.permute.xlu1 %1879 }
 0x92c   : > { %1872 = vrot.lane.b32.xlu0 %v1870_v61, %s4005_s10 }
 0x92f   : > { %v2038_v62 = vld [vmem:[#allocation2 + $0x8] sm:$0xf] }
 0x930   : > { %2040 = vrot.lane.b32.xlu1 %v2038_v62, %s4005_s10 }
 0x99a   : > { %v1971_v50 = vpop.permute.xlu0 %1970 }
 0x99b   : > { %1974 = vst.msk [vmem:[#allocation2 + $0x4] sm:$0xf] %vm1973_vm13, %v1971_v50 }
 0x99e   : > { %v1873_v1 = vpop.permute.xlu0 %1872 }
 0x99f   : > { %1876 = vst.msk [vmem:[#allocation2] sm:$0xf] %vm1875_vm11, %v1873_v1 }
 0x9a0   : > { %1883 = vst.msk [vmem:[#allocation2] sm:$0xf] %vm1882_vm12, %v1880_v63  ;;  %v3757_v63 = vld [vmem:[%s4467_s2 + $0x20] sm:$0xf] }
 0x9a2   : > { %v2041_v2 = vpop.permute.xlu1 %2040  ;;  %v1975_v3 = vld [vmem:[#allocation2 + $0x4] sm:$0xf] }
 0x9a3   : > { %1977 = vrot.lane.b32.xlu0 %v1975_v3, %s3996_s22  ;;  %2044 = vst.msk [vmem:[#allocation2 + $0x8] sm:$0xf] %vm2043_vm14, %v2041_v2 }
 0x9aa   : > { %v2047_v4 = vld [vmem:[#allocation2 + $0x8] sm:$0xf] }
 0x9ab   : > { %2057 = vrot.lane.b32.xlu1 %v2047_v4, %s3995_s21  ;;  %v2532_v14 = vld [vmem:[#allocation2 + $0x8] sm:$0xf] }
 0x9ac   : > { %v2364_v15 = vld [vmem:[#allocation2 + $0x8] sm:$0xf] }
 0x9ad   : > { %v2868_v16 = vld [vmem:[#allocation2 + $0x8] sm:$0xf] }
 0x9ae   : > { %v2700_v17 = vld [vmem:[#allocation2 + $0x8] sm:$0xf] }
 0x9af   : > { %v3204_v18 = vld [vmem:[#allocation2 + $0x8] sm:$0xf] }
 0x9b0   : > { %v3036_v19 = vld [vmem:[#allocation2 + $0x8] sm:$0xf] }
 0x9b1   : > { %v3372_v20 = vld [vmem:[#allocation2 + $0x8] sm:$0xf] }
 0xa15   : > { %v1978_v8 = vpop.permute.xlu0 %1977 }
 0xa16   : > { %1981 = vst.msk [vmem:[#allocation2 + $0x4] sm:$0xf] %vm1980_vm15, %v1978_v8 }
 0xa1d   : > { %v2058_v10 = vpop.permute.xlu1 %2057  ;;  %v2363_v11 = vld [vmem:[#allocation2] sm:$0xff] }
 0xa1e   : > { %3847 = vmatpush3.msk.msra.mxu1 %vm221_vm1, %v2058_v10  ;;  %v2367_v12 = vcombine.high %v2363_v11, %v2363_v11 }
 0xa1f   : > { %3851 = vmatprep.subr.mxu1 %v3993_v0  ;;  %3849 = vmatmul.mubr.msk.f32.vlgmr.msra.gmra.mrb[2].mxu1 %vm217_vm3, %v3710_v9 }
 0xa20   : > { %3852 = vmatpush3.msk.msra.mxu1 %vm221_vm1, %v2047_v4  ;;  %2370 = vrot.lane.b32.xlu1 %v2367_v12, %s3996_s22 }
 0xa21   : > { %2055 = vrot.lane.b32.xlu0 %v2367_v12, %s3995_s21  ;;  %3853 = vmatprep.mubr.msk.f32.mxu1 %vm3994_vm0, %v3993_v0 }
 0xa22   : > { %3856 = vmatprep.subr.mxu1 %v3993_v0 }
 0xa24   : > { %2368 = vrot.lane.b32.xlu1 %v2363_v11, %s3996_s22 }
 0xa25   : > { %2053 = vrot.lane.b32.xlu0 %v2363_v11, %s3995_s21 }
 0xa27   : > { %3854 = vmatmul.mubr.msk.f32.vlgmr.msra.gmra.mrb[2].mxu1 %vm217_vm3, %v2045_v13 }
 0xa28   : > { %2540 = vrot.lane.b32.xlu1 %v2532_v14, %s3997_s23  ;;  %3858 = vmatprep.mubr.msk.f32.mxu1 %vm3994_vm0, %v3993_v0 }
 0xa29   : > { %2372 = vrot.lane.b32.xlu0 %v2364_v15, %s3996_s22 }
 0xa2c   : > { %2706 = vrot.lane.b32.xlu1 %v2367_v12, %s3998_s24 }
 0xa2d   : > { %2538 = vrot.lane.b32.xlu0 %v2367_v12, %s3997_s23 }
 0xa30   : > { %2704 = vrot.lane.b32.xlu1 %v2363_v11, %s3998_s24 }
 0xa31   : > { %2536 = vrot.lane.b32.xlu0 %v2363_v11, %s3997_s23 }
 0xa34   : > { %2876 = vrot.lane.b32.xlu1 %v2868_v16, %s3999_s25 }
 0xa35   : > { %2708 = vrot.lane.b32.xlu0 %v2700_v17, %s3998_s24 }
 0xa38   : > { %3042 = vrot.lane.b32.xlu1 %v2367_v12, %s4000_s26 }
 0xa39   : > { %2874 = vrot.lane.b32.xlu0 %v2367_v12, %s3999_s25 }
 0xa3c   : > { %3040 = vrot.lane.b32.xlu1 %v2363_v11, %s4000_s26 }
 0xa3d   : > { %2872 = vrot.lane.b32.xlu0 %v2363_v11, %s3999_s25 }
 0xa40   : > { %3212 = vrot.lane.b32.xlu1 %v3204_v18, %s4001_s27  ;;  %v3570_v18 = vld [vmem:[%s4052_s20] sm:$0xff] }
 0xa41   : > { %3044 = vrot.lane.b32.xlu0 %v3036_v19, %s4000_s26  ;;  %v3571_v19 = vld [vmem:[%s4052_s20 + $0x8] sm:$0xf] }
 0xa44   : > { %3378 = vrot.lane.b32.xlu1 %v2367_v12, %s4002_s28 }
 0xa45   : > { %3210 = vrot.lane.b32.xlu0 %v2367_v12, %s4001_s27 }
 0xa48   : > { %3376 = vrot.lane.b32.xlu1 %v2363_v11, %s4002_s28 }
 0xa49   : > { %3208 = vrot.lane.b32.xlu0 %v2363_v11, %s4001_s27 }
 0xa4d   : > { %3380 = vrot.lane.b32.xlu0 %v3372_v20, %s4002_s28 }
 0xa92   : > { %v2371_v21 = vpop.permute.xlu1 %2370 }
 0xa93   : > { %v2056_v22 = vpop.permute.xlu0 %2055 }
 0xa94   : > { %v2060_v23 = vsel %vm214_vm2, %v2056_v22, %v2058_v10 }
 0xa95   : > { %3711 = vmatprep.subr.msk.mxu0 %vm221_vm1, %v2060_v23 }
 0xa96   : > { %v2369_v24 = vpop.permute.xlu1 %2368 }
 0xa97   : > { %v2054_v25 = vpop.permute.xlu0 %2053  ;;  %v2374_v33 = vsel %vm532_vm4, %v2369_v24, %v2371_v21 }
 0xa98   : > { %v2059_v26 = vsel %vm214_vm2, %v2054_v25, %v2056_v22  ;;  %vm4475_vm2 = vcmask 736256  }
 0xa99   : > { %3712 = vmatpush1.msk.msra.mxu0 %vm221_vm1, %v2059_v26 }
 0xa9a   : > { %3713 = vmatmul.mubr.msk.f32.vlgmr.msra.gmra.mrb[2].mxu0 %vm217_vm3, %v3710_v9  ;;  %3716 = vmatprep.subr.msk.mxu0 %vm221_vm1, %v2367_v12  ;;  %v2541_v27 = vpop.permute.xlu1 %2540 }
 0xa9b   : > { %3717 = vmatpush1.msk.msra.mxu0 %vm221_vm1, %v2363_v11  ;;  %v2373_v29 = vpop.permute.xlu0 %2372  ;;  %2284 = vmatprep.mubr.f32.mxu0 %v3993_v0 }
 0xa9c   : > { %v2375_v30 = vsel %vm532_vm4, %v2371_v21, %v2373_v29  ;;  %3857 = vmatpush3.msk.msra.mxu1 %vm221_vm1, %v2373_v29  ;;  %vm4477_vm4 = vcmp.eq.s32.totalorder %v4214_v5, 1 }
 0xa9d   : > { %3722 = vmatprep.subr.msk.mxu0 %vm221_vm1, %v2375_v30  ;;  %3859 = vmatmul.mubr.msk.f32.vlgmr.msra.gmra.mrb[2].mxu1 %vm217_vm3, %v3721_v28 }
 0xa9e   : > { %3861 = vmatprep.subr.mxu1 %v3993_v0  ;;  %3863 = vmatprep.mubr.msk.f32.mxu1 %vm3994_vm0, %v3993_v0  ;;  %v2707_v31 = vpop.permute.xlu1 %2706 }
 0xa9f   : > { %3862 = vmatpush3.msk.msra.mxu1 %vm221_vm1, %v2541_v27  ;;  %v2539_v32 = vpop.permute.xlu0 %2538 }
 0xaa0   : > { %3866 = vmatprep.subr.mxu1 %v3993_v0  ;;  %v2543_v35 = vsel %vm701_vm5, %v2539_v32, %v2541_v27 }
 0xaa2   : > { %3718 = vmatmul.mubr.msk.f32.vlgmr.msra.gmra.mrb[2].mxu0 %vm217_vm3, %v2045_v13  ;;  %v2705_v37 = vpop.permute.xlu1 %2704 }
 0xaa3   : > { %3723 = vmatpush1.msk.msra.mxu0 %vm221_vm1, %v2374_v33  ;;  %v2537_v36 = vpop.permute.xlu0 %2536  ;;  %2449 = vmatprep.mubr.f32.mxu0 %v3993_v0  ;;  %v2710_v46 = vsel %vm870_vm6, %v2705_v37, %v2707_v31 }
 0xaa4   : > { %3728 = vmatprep.subr.msk.mxu0 %vm221_vm1, %v2543_v35  ;;  %v2542_v39 = vsel %vm701_vm5, %v2537_v36, %v2539_v32  ;;  %vm4478_vm5 = vcmp.eq.s32.totalorder %v4216_v6, 1  ;;  %v3574_v36 = vcombine.high %v3570_v18, %v3570_v18 }
 0xaa5   : > { %3864 = vmatmul.mubr.msk.f32.vlgmr.msra.gmra.mrb[2].mxu1 %vm217_vm3, %v3727_v34  ;;  %vm4483_vm10 = vmmov %vm4478_vm5 }
 0xaa6   : > { %3868 = vmatprep.mubr.msk.f32.mxu1 %vm3994_vm0, %v3993_v0  ;;  %v2877_v41 = vpop.permute.xlu1 %2876 }
 0xaa7   : > { %v2709_v38 = vpop.permute.xlu0 %2708 }
 0xaa8   : > { %3867 = vmatpush3.msk.msra.mxu1 %vm221_vm1, %v2709_v38  ;;  %v2711_v42 = vsel %vm870_vm6, %v2707_v31, %v2709_v38 }
 0xaa9   : > { %3871 = vmatprep.subr.mxu1 %v3993_v0 }
 0xaaa   : > { %3724 = vmatmul.mubr.msk.f32.vlgmr.msra.gmra.mrb[2].mxu0 %vm217_vm3, %v3721_v28  ;;  %v3043_v45 = vpop.permute.xlu1 %3042 }
 0xaab   : > { %3729 = vmatpush1.msk.msra.mxu0 %vm221_vm1, %v2542_v39  ;;  %v2875_v43 = vpop.permute.xlu0 %2874  ;;  %2617 = vmatprep.mubr.f32.mxu0 %v3993_v0 }
 0xaac   : > { %3734 = vmatprep.subr.msk.mxu0 %vm221_vm1, %v2711_v42  ;;  %v2879_v48 = vsel %vm1039_vm7, %v2875_v43, %v2877_v41 }
 0xaad   : > { %3869 = vmatmul.mubr.msk.f32.vlgmr.msra.gmra.mrb[2].mxu1 %vm217_vm3, %v3733_v40 }
 0xaae   : > { %3872 = vmatpush3.msk.msra.mxu1 %vm221_vm1, %v2877_v41  ;;  %3873 = vmatprep.mubr.msk.f32.mxu1 %vm3994_vm0, %v3993_v0  ;;  %v3041_v51 = vpop.permute.xlu1 %3040 }
 0xaaf   : > { %v2873_v44 = vpop.permute.xlu0 %2872  ;;  %3876 = vmatprep.subr.mxu1 %v3993_v0  ;;  %v3046_v58 = vsel %vm1208_vm8, %v3041_v51, %v3043_v45 }
 0xab0   : > { %v2878_v53 = vsel %vm1039_vm7, %v2873_v44, %v2875_v43  ;;  %vm4479_vm7 = vcmp.eq.s32.totalorder %v4218_v7, 1 }
 0xab2   : > { %3730 = vmatmul.mubr.msk.f32.vlgmr.msra.gmra.mrb[2].mxu0 %vm217_vm3, %v3727_v34  ;;  %v3213_v56 = vpop.permute.xlu1 %3212 }
 0xab3   : > { %3735 = vmatpush1.msk.msra.mxu0 %vm221_vm1, %v2710_v46  ;;  %v3045_v49 = vpop.permute.xlu0 %3044  ;;  %2785 = vmatprep.mubr.f32.mxu0 %v3993_v0 }
 0xab4   : > { %3740 = vmatprep.subr.msk.mxu0 %vm221_vm1, %v2879_v48  ;;  %v3047_v55 = vsel %vm1208_vm8, %v3043_v45, %v3045_v49  ;;  %vm4481_vm8 = vmmov %vm4477_vm4 }
 0xab5   : > { %3874 = vmatmul.mubr.msk.f32.vlgmr.msra.gmra.mrb[2].mxu1 %vm217_vm3, %v3739_v47 }
 0xab6   : > { %3877 = vmatpush3.msk.msra.mxu1 %vm221_vm1, %v3045_v49  ;;  %3878 = vmatprep.mubr.msk.f32.mxu1 %vm3994_vm0, %v3993_v0  ;;  %v3379_v62 = vpop.permute.xlu1 %3378 }
 0xab7   : > { %3881 = vmatprep.subr.mxu1 %v3993_v0  ;;  %v3211_v52 = vpop.permute.xlu0 %3210 }
 0xab8   : > { %v3215_v60 = vsel %vm1377_vm9, %v3211_v52, %v3213_v56 }
 0xaba   : > { %3736 = vmatmul.mubr.msk.f32.vlgmr.msra.gmra.mrb[2].mxu0 %vm217_vm3, %v3733_v40  ;;  %v3377_v2 = vpop.permute.xlu1 %3376 }
 0xabb   : > { %3741 = vmatpush1.msk.msra.mxu0 %vm221_vm1, %v2878_v53  ;;  %2953 = vmatprep.mubr.f32.mxu0 %v3993_v0  ;;  %v3209_v57 = vpop.permute.xlu0 %3208 }
 0xabc   : > { %3746 = vmatprep.subr.msk.mxu0 %vm221_vm1, %v3047_v55  ;;  %v3214_v50 = vsel %vm1377_vm9, %v3209_v57, %v3211_v52  ;;  %vm4482_vm9 = vmmov %vm4479_vm7 }
 0xabd   : > { %3879 = vmatmul.mubr.msk.f32.vlgmr.msra.gmra.mrb[2].mxu1 %vm217_vm3, %v3745_v54 }
 0xabe   : > { %3882 = vmatpush3.msk.msra.mxu1 %vm221_vm1, %v3213_v56  ;;  %3883 = vmatprep.mubr.msk.f32.mxu1 %vm3994_vm0, %v3993_v0 }
 0xabf   : > { %3886 = vmatprep.subr.mxu1 %v3993_v0  ;;  %v3381_v61 = vpop.permute.xlu0 %3380 }
 0xac0   : > { %v3383_v1 = vsel %vm4475_vm2, %v3379_v62, %v3381_v61 }
 0xac2   : > { %3742 = vmatmul.mubr.msk.f32.vlgmr.msra.gmra.mrb[2].mxu0 %vm217_vm3, %v3739_v47 }
 0xac3   : > { %3747 = vmatpush1.msk.msra.mxu0 %vm221_vm1, %v3046_v58  ;;  %3121 = vmatprep.mubr.f32.mxu0 %v3993_v0 }
 0xac4   : > { %3752 = vmatprep.subr.msk.mxu0 %vm221_vm1, %v3215_v60 }
 0xac5   : > { %3884 = vmatmul.mubr.msk.f32.vlgmr.msra.gmra.mrb[2].mxu1 %vm217_vm3, %v3751_v59 }
 0xac6   : > { %3887 = vmatpush3.msk.msra.mxu1 %vm221_vm1, %v3381_v61  ;;  %3888 = vmatprep.mubr.msk.f32.mxu1 %vm3994_vm0, %v3993_v0  ;;  %vm4476_vm0 = vmmov %vm4475_vm2 }
 0xac7   : > { %v3382_v3 = vsel %vm4476_vm0, %v3377_v2, %v3379_v62 }
 0xaca   : > { %3748 = vmatmul.mubr.msk.f32.vlgmr.msra.gmra.mrb[2].mxu0 %vm217_vm3, %v3745_v54 }
 0xacb   : > { %3753 = vmatpush1.msk.msra.mxu0 %vm221_vm1, %v3214_v50  ;;  %3289 = vmatprep.mubr.f32.mxu0 %v3993_v0 }
 0xacc   : > { %3758 = vmatprep.subr.msk.mxu0 %vm221_vm1, %v3383_v1 }
 0xacd   : > { %3889 = vmatmul.mubr.msk.f32.vlgmr.msra.gmra.mrb[2].mxu1 %vm217_vm3, %v3757_v63 }
 0xad2   : > { %3754 = vmatmul.mubr.msk.f32.vlgmr.msra.gmra.mrb[2].mxu0 %vm217_vm3, %v3751_v59 }
 0xad3   : > { %3759 = vmatpush1.msk.msra.mxu0 %vm221_vm1, %v3382_v3  ;;  %3457 = vmatprep.mubr.f32.mxu0 %v3993_v0 }
 0xada   : > { %3760 = vmatmul.mubr.msk.f32.vlgmr.msra.gmra.mrb[2].mxu0 %vm217_vm3, %v3757_v63  ;;  %vm4480_vm3 = vcmask 551936  }
 0xadb   : > { %vm4484_vm13 = vmmov %vm4480_vm3 }
 0xba0   : > { %v3530_v4 = vpop.f32.mrb[2].mxu1 }
 0xba1   : > { %v3890_v8 = vpop.f32.mrb[3].mxu1  ;;  %v3539_v12 = vsel %vm4478_vm5, %v3530_v4, 0.0 }
 0xba2   : > { %v3543_v16 = vsel %vm4480_vm3, %v3539_v12, 0.0 }
 0xbad   : > { %v3459_v9 = vpop.f32.mrb[2].mxu0 }
 0xbae   : > { %v3537_v10 = vsel %vm4477_vm4, %v3459_v9, 0.0  ;;  %v3461_v11 = vpop.f32.mrb[3].mxu0 }
 0xbaf   : > { %v3540_v13 = vsel %vm221_vm1, %v3537_v10, 0.0  ;;  %v3538_v14 = vsel %vm4479_vm7, %v3461_v11, 0.0 }
 0xbb0   : > { %v3541_v0 = vsel %vm221_vm1, %v3538_v14, 0.0 }
 0xbb1   : > { %v3542_v15 = vadd.f32 %v3541_v0, %v3540_v13 }
 0xbb3   : > { %v3544_v17 = vadd.f32 %v3543_v16, %v3542_v15 }
 0xbb5   : > { %3545 = vadd.xlane.f32.xlu0 %v3544_v17 }
 0xbcb   : > { %3575 = vrot.lane.b32.xlu0 %v3570_v18, %s3998_s24 }
 0xbcf   : > { %3579 = vrot.lane.b32.xlu0 %v3571_v19, %s3998_s24 }
 0xc42   : > { %v3546_v20 = vpop.xlane.xlu0 %3545 }
 0xc43   : > { %v3547_v21 = vmul.f32 0.00390625, %v3546_v20 }
 0xc45   : > { %v3548_v22 = vsub.f32 %v3459_v9, %v3547_v21  ;;  %v3549_v23 = vsub.f32 %v3461_v11, %v3547_v21  ;;  %v3550_v24 = vsub.f32 %v3530_v4, %v3547_v21 }
 0xc46   : > { %v3576_v38 = vpop.permute.xlu0 %3575 }
 0xc47   : > { %v3551_v25 = vmul.f32 %v3548_v22, %v3548_v22  ;;  %v3552_v26 = vmul.f32 %v3549_v23, %v3549_v23  ;;  %v3553_v27 = vmul.f32 %v3550_v24, %v3550_v24 }
 0xc49   : > { %v3554_v28 = vsel %vm4481_vm8, %v3551_v25, 0.0  ;;  %v3555_v29 = vsel %vm4482_vm9, %v3552_v26, 0.0  ;;  %v3556_v30 = vsel %vm4483_vm10, %v3553_v27, 0.0 }
 0xc4a   : > { %v3557_v31 = vsel %vm221_vm1, %v3554_v28, 0.0  ;;  %v3558_v32 = vsel %vm221_vm1, %v3555_v29, 0.0  ;;  %v3560_v34 = vsel %vm4484_vm13, %v3556_v30, 0.0  ;;  %v3580_v6 = vpop.permute.xlu0 %3579  ;;  %vm4485_vm1 = vmmov %vm4480_vm3 }
 0xc4b   : > { %v3559_v33 = vadd.f32 %v3558_v32, %v3557_v31 }
 0xc4d   : > { %v3561_v35 = vadd.f32 %v3560_v34, %v3559_v33 }
 0xc4f   : > { %3562 = vadd.xlane.f32.xlu1 %v3561_v35 }
 0xc60   : > { %3577 = vrot.lane.b32.xlu1 %v3574_v36, %s3998_s24  ;;  %s197_s24 = scalar_lea.vmem %s4469_s4, %s3955_s17 }
 0xcdc   : > { %v3563_v5 = vpop.xlane.xlu1 %3562 }
 0xcdd   : > { %v3564_v37 = vmul.f32 0.00390625, %v3563_v5 }
 0xcdf   : > { %v3565_v7 = vadd.f32 1e-05, %v3564_v37 }
 0xce0   : > { %v3578_v39 = vpop.permute.xlu1 %3577 }
 0xce1   : > { %3983 = vrsqrt.f32 %v3565_v7  ;;  %v3582_v41 = vsel %vm870_vm6, %v3578_v39, %v3580_v6  ;;  %v3581_v45 = vsel %vm870_vm6, %v3576_v38, %v3578_v39 }
 0xceb   : > { %v3984_v40 = vpop.eup %3983 }
 0xcec   : > { %v3567_v42 = vmul.f32 %v3984_v40, %v3548_v22  ;;  %v3568_v43 = vmul.f32 %v3984_v40, %v3549_v23  ;;  %v3569_v44 = vmul.f32 %v3984_v40, %v3550_v24 }
 0xcee   : > { %v3586_v46 = vadd.f32 %v3581_v45, %v3567_v42  ;;  %v3587_v47 = vadd.f32 %v3582_v41, %v3568_v43  ;;  %v3588_v48 = vadd.f32 %v3580_v6, %v3569_v44 }
 0xcf0   : > { %v3591_v49 = vcombine.low %v3586_v46, %v3587_v47  ;;  %3594 = vst.msk [vmem:[%s197_s24 + $0x8] sm:$0xf] %vm4485_vm1, %v3588_v48 }
 0xcf2   : > { %3593 = vst [vmem:[%s197_s24] sm:$0xff] %v3591_v49 }
 0xcf3 PF: > { %s14_s15 = sadd.s32 1, %s3991_s15  }
 0xcf4   : > { %p11_p4 = scmp.ge.s32.totalorder %s14_s15, 4  }
 0xcf6   :  { %13 = sbr.rel (!%p11_p4) target bundleno = 1 (0x1), region = 82 }

</bundles_post_ra>
